<compile_context>
chip_gen: v6e
topology: v6e:2x2x1
jax: 0.10.0
libtpu: 0.0.40
codegen_flags: <defaults>
</compile_context>

<pallas_src>
import jax
import jax.numpy as jnp
from jax.experimental import pallas as pl
from jax.experimental.pallas import tpu as pltpu

# ----------------------------- configuration ------------------------------
D_IN = 64        # flat VFT input dim
H_ENC = 128      # encoder hidden
ZFC = 32         # zfc_size for type='vft'
LATENT = 8       # latent_dim
H_DEC = 128      # decoder hidden
D_OUT = D_IN     # decoder reconstructs the input vector

TILE_B = 256     # batch tile per grid step
OUT_W = 128      # lane-dense packed output width

# Weight-slab row offsets (all bf16-tile aligned: multiples of 16).
R_WE1 = 0
R_WE2 = R_WE1 + D_IN      # 64
R_WML = R_WE2 + H_ENC     # 192
R_WFD = R_WML + ZFC       # 224  (folded wml_mu @ wd1)
R_WD2 = R_WFD + ZFC       # 256
W_ROWS = R_WD2 + H_DEC    # 384

N_BIAS_ROWS = 8           # be1, be2, bml, b_fold, bd2, 3 pad rows


# ------------------------------- kernel -----------------------------------
def vae_kernel(x_ref, w_ref, b_ref, out_ref):
    x = x_ref[...].astype(jnp.bfloat16)

    # ---- encoder layer 1: (TB, D_IN) @ (D_IN, H_ENC) ----
    h = jnp.dot(x, w_ref[R_WE1:R_WE2, :], preferred_element_type=jnp.float32)
    h = jnp.maximum(h + b_ref[0:1, :], 0.0)

    # ---- encoder layer 2 -> zfc: (TB, H_ENC) @ (H_ENC, ZFC) ----
    zfc = jnp.dot(h.astype(jnp.bfloat16), w_ref[R_WE2:R_WML, 0:ZFC],
                  preferred_element_type=jnp.float32)
    zfc = jnp.maximum(zfc + b_ref[1:2, 0:ZFC], 0.0)
    zfc_bf = zfc.astype(jnp.bfloat16)

    # ---- l_mu_logvar: (TB, ZFC) @ (ZFC, 2*LATENT) -> [mu | logvar] ----
    ml = jnp.dot(zfc_bf, w_ref[R_WML:R_WFD, 0:2 * LATENT],
                 preferred_element_type=jnp.float32)
    ml = ml + b_ref[2:3, 0:2 * LATENT]

    # ---- decoder hidden (eval-mode folded): zfc @ W_fold + b_fold ----
    # equivalent to relu(mu @ wd1 + bd1) with pred_z = mu
    d = jnp.dot(zfc_bf, w_ref[R_WFD:R_WD2, :], preferred_element_type=jnp.float32)
    d = jnp.maximum(d + b_ref[3:4, :], 0.0)

    # ---- decoder output layer + sigmoid ----
    px = jnp.dot(d.astype(jnp.bfloat16), w_ref[R_WD2:W_ROWS, 0:D_OUT],
                 preferred_element_type=jnp.float32)
    px = jax.nn.sigmoid(px + b_ref[4:5, 0:D_OUT])

    # Single lane-dense (TB, 128) store: [pred_x | mu | logvar | zero-pad].
    pad = jnp.zeros((px.shape[0], OUT_W - D_OUT - 2 * LATENT), jnp.float32)
    out_ref[...] = jnp.concatenate([px, ml, pad], axis=-1)


# ------------------------------- wrapper -----------------------------------
def vae_forward(x, packed_params):
    """Returns ([pred_x], [mu, logvar]) matching PyTorch VAE.forward (eval)."""
    w_slab, b_slab = packed_params
    b_in = x.shape[0]

    # Pad batch to a multiple of TILE_B (sliced back afterwards).
    b_pad = ((b_in + TILE_B - 1) // TILE_B) * TILE_B
    if b_pad != b_in:
        x = jnp.pad(x, ((0, b_pad - b_in), (0, 0)))
    grid = (b_pad // TILE_B,)

    out = pl.pallas_call(
        vae_kernel,
        out_shape=jax.ShapeDtypeStruct((b_pad, OUT_W), jnp.float32),
        grid_spec=pltpu.PrefetchScalarGridSpec(
            num_scalar_prefetch=0,
            grid=grid,
            in_specs=[
                pl.BlockSpec((TILE_B, D_IN), lambda i: (i, 0)),
                # Weight / bias slabs: constant index_map -> VMEM-resident
                # across all grid steps (DMA'd once per call).
                pl.BlockSpec((W_ROWS, 128), lambda i: (0, 0)),
                pl.BlockSpec((N_BIAS_ROWS, 128), lambda i: (0, 0)),
            ],
            out_specs=pl.BlockSpec((TILE_B, OUT_W), lambda i: (i, 0)),
        ),
        compiler_params=pltpu.CompilerParams(
            dimension_semantics=("parallel",)),
    )(x, w_slab, b_slab)

    out = out[:b_in]
    pred_x = out[:, :D_OUT]
    mu = out[:, D_OUT:D_OUT + LATENT]
    logvar = out[:, D_OUT + LATENT:D_OUT + 2 * LATENT]
    return [pred_x], [mu, logvar]


def init_params(key):
    """Deterministic synthetic weights (shapes implied by the module)."""
    ks = jax.random.split(key, 5)

    def lin(kw, fan_in, fan_out):
        scale = 1.0 / jnp.sqrt(jnp.float32(fan_in))
        w = jax.random.uniform(kw, (fan_in, fan_out), jnp.float32, -scale, scale)
        b = jax.random.uniform(kw, (fan_out,), jnp.float32, -scale, scale)
        return w, b

    we1, be1 = lin(ks[0], D_IN, H_ENC)        # VFTEncoder layer 1
    we2, be2 = lin(ks[1], H_ENC, ZFC)         # VFTEncoder layer 2 (-> z_size=32)
    wml, bml = lin(ks[2], ZFC, 2 * LATENT)    # l_mu_logvar: Linear(32, 2*latent)
    wd1, bd1 = lin(ks[3], LATENT, H_DEC)      # VFTDecoder layer 1
    wd2, bd2 = lin(ks[4], H_DEC, D_OUT)       # VFTDecoder layer 2
    return dict(we1=we1, be1=be1, we2=we2, be2=be2, wml=wml, bml=bml,
                wd1=wd1, bd1=bd1, wd2=wd2, bd2=bd2)


def pack_params(p):
    """Pack 10 tensors into one bf16 weight slab + one f32 bias slab.

    Also applies the eval-mode folding (valid only because pred_z = mu):
        W_fold = wml[:, :LATENT] @ wd1
        b_fold = bml[:LATENT] @ wd1 + bd1
    """
    wml_mu = p['wml'][:, :LATENT]
    bml_mu = p['bml'][:LATENT]
    w_fold = wml_mu @ p['wd1']                      # (ZFC, H_DEC)
    b_fold = bml_mu @ p['wd1'] + p['bd1']           # (H_DEC,)

    def pad_cols(w):
        return jnp.pad(w, ((0, 0), (0, 128 - w.shape[1])))

    w_slab = jnp.concatenate([
        pad_cols(p['we1']),    # rows [R_WE1, R_WE2)
        pad_cols(p['we2']),    # rows [R_WE2, R_WML)
        pad_cols(p['wml']),    # rows [R_WML, R_WFD)
        pad_cols(w_fold),      # rows [R_WFD, R_WD2)
        pad_cols(p['wd2']),    # rows [R_WD2, W_ROWS)
    ], axis=0).astype(jnp.bfloat16)
    assert w_slab.shape == (W_ROWS, 128)

    def pad_row(b):
        return jnp.pad(b, (0, 128 - b.shape[0]))[None, :]

    b_slab = jnp.concatenate([
        pad_row(p['be1']), pad_row(p['be2']), pad_row(p['bml']),
        pad_row(b_fold), pad_row(p['bd2']),
        jnp.zeros((N_BIAS_ROWS - 5, 128), jnp.float32),
    ], axis=0)
    assert b_slab.shape == (N_BIAS_ROWS, 128)
    return w_slab, b_slab


def vae_reference(x, p):
    """Pure-JAX f32 reference of the eval-mode forward (unfused)."""
    h = jnp.maximum(x @ p['we1'] + p['be1'], 0.0)
    zfc = jnp.maximum(h @ p['we2'] + p['be2'], 0.0)
    out = zfc @ p['wml'] + p['bml']
    mu, logvar = out[:, :LATENT], out[:, LATENT:2 * LATENT]
    d = jnp.maximum(mu @ p['wd1'] + p['bd1'], 0.0)
    px = jax.nn.sigmoid(d @ p['wd2'] + p['bd2'])
    return px, mu, logvar


if __name__ == "__main__":
    key = jax.random.PRNGKey(0)
    k_x, k_p = jax.random.split(key)

    B = 512                                      # amortizes fixed overhead; grid=(2,)
    x = jax.random.normal(k_x, (B, D_IN), dtype=jnp.float32)
    params = init_params(k_p)
    packed = pack_params(params)

    pred_x_list, stats = vae_forward(x, packed)
    pred_x = jax.block_until_ready(pred_x_list[0])
    mu = jax.block_until_ready(stats[0])
    logvar = jax.block_until_ready(stats[1])

    assert pred_x.shape == (B, D_OUT)
    assert mu.shape == (B, LATENT)
    assert logvar.shape == (B, LATENT)
    assert bool(jnp.all(jnp.isfinite(pred_x)))
    assert bool(jnp.all((pred_x >= 0.0) & (pred_x <= 1.0)))

    # Loose numerical check vs. f32 reference (bf16 MXU path -> small diffs).
    px_ref, mu_ref, lv_ref = vae_reference(x, params)
    assert float(jnp.max(jnp.abs(pred_x - px_ref))) < 0.1
    assert float(jnp.max(jnp.abs(mu - mu_ref))) < 0.1
    assert float(jnp.max(jnp.abs(logvar - lv_ref))) < 0.1

    print("KERNEL_OK")
</pallas_src>

<mosaic_0001>
module attributes {stable_mosaic.version = 11 : i64} {
  func.func @vae_kernel(%arg0: i32, %arg1: memref<256x64xf32, #tpu.memory_space<vmem>>, %arg2: memref<384x128xbf16, #tpu.memory_space<vmem>>, %arg3: memref<8x128xf32, #tpu.memory_space<vmem>>, %arg4: memref<256x128xf32, #tpu.memory_space<vmem>>) attributes {dimension_semantics = [#tpu.dimension_semantics<parallel>], iteration_bounds = array<i64: 2>, scalar_prefetch = 0 : i64, scratch_operands = 0 : i64, tpu.core_type = #tpu.core_type<tc>, window_params = [{transform_indices = @transform_0, window_bounds = array<i64: 256, 64>}, {pipeline_mode = #tpu.pipeline_mode<synchronous>, transform_indices = @transform_1, window_bounds = array<i64: 384, 128>}, {pipeline_mode = #tpu.pipeline_mode<synchronous>, transform_indices = @transform_2, window_bounds = array<i64: 8, 128>}, {transform_indices = @transform_3, window_bounds = array<i64: 256, 128>}]} {
    %c0 = arith.constant 0 : index
    %c0_0 = arith.constant 0 : index
    %0 = vector.load %arg1[%c0, %c0_0] : memref<256x64xf32, #tpu.memory_space<vmem>>, vector<256x64xf32>
    %1 = arith.truncf %0 : vector<256x64xf32> to vector<256x64xbf16>
    %c0_1 = arith.constant 0 : index
    %c0_2 = arith.constant 0 : index
    %2 = vector.load %arg2[%c0_1, %c0_2] : memref<384x128xbf16, #tpu.memory_space<vmem>>, vector<64x128xbf16>
    %cst = arith.constant dense<0.000000e+00> : vector<256x128xf32>
    %3 = tpu.matmul %1, %2, %cst {dimension_numbers = #tpu.dot_dimension_numbers<[1], [0], [0], [1], [0, 0, 1, 1], [], []>} : vector<256x64xbf16>, vector<64x128xbf16>, vector<256x128xf32> -> vector<256x128xf32>
    %c0_3 = arith.constant 0 : index
    %c0_4 = arith.constant 0 : index
    %4 = vector.load %arg3[%c0_3, %c0_4] : memref<8x128xf32, #tpu.memory_space<vmem>>, vector<1x128xf32>
    %5 = vector.broadcast %4 : vector<1x128xf32> to vector<256x128xf32>
    %6 = arith.addf %3, %5 : vector<256x128xf32>
    %cst_5 = arith.constant 0.000000e+00 : f32
    %7 = vector.broadcast %cst_5 : f32 to vector<256x128xf32>
    %8 = arith.maximumf %6, %7 : vector<256x128xf32>
    %9 = arith.truncf %8 : vector<256x128xf32> to vector<256x128xbf16>
    %c64 = arith.constant 64 : index
    %c0_6 = arith.constant 0 : index
    %10 = vector.load %arg2[%c64, %c0_6] : memref<384x128xbf16, #tpu.memory_space<vmem>>, vector<128x32xbf16>
    %cst_7 = arith.constant dense<0.000000e+00> : vector<256x32xf32>
    %11 = tpu.matmul %9, %10, %cst_7 {dimension_numbers = #tpu.dot_dimension_numbers<[1], [0], [0], [1], [0, 0, 1, 1], [], []>} : vector<256x128xbf16>, vector<128x32xbf16>, vector<256x32xf32> -> vector<256x32xf32>
    %c1 = arith.constant 1 : index
    %c0_8 = arith.constant 0 : index
    %12 = vector.load %arg3[%c1, %c0_8] : memref<8x128xf32, #tpu.memory_space<vmem>>, vector<1x32xf32>
    %13 = vector.broadcast %12 : vector<1x32xf32> to vector<256x32xf32>
    %14 = arith.addf %11, %13 : vector<256x32xf32>
    %cst_9 = arith.constant 0.000000e+00 : f32
    %15 = vector.broadcast %cst_9 : f32 to vector<256x32xf32>
    %16 = arith.maximumf %14, %15 : vector<256x32xf32>
    %17 = arith.truncf %16 : vector<256x32xf32> to vector<256x32xbf16>
    %c192 = arith.constant 192 : index
    %c0_10 = arith.constant 0 : index
    %18 = vector.load %arg2[%c192, %c0_10] : memref<384x128xbf16, #tpu.memory_space<vmem>>, vector<32x16xbf16>
    %cst_11 = arith.constant dense<0.000000e+00> : vector<256x16xf32>
    %19 = tpu.matmul %17, %18, %cst_11 {dimension_numbers = #tpu.dot_dimension_numbers<[1], [0], [0], [1], [0, 0, 1, 1], [], []>} : vector<256x32xbf16>, vector<32x16xbf16>, vector<256x16xf32> -> vector<256x16xf32>
    %c2 = arith.constant 2 : index
    %c0_12 = arith.constant 0 : index
    %20 = vector.load %arg3[%c2, %c0_12] : memref<8x128xf32, #tpu.memory_space<vmem>>, vector<1x16xf32>
    %21 = vector.broadcast %20 : vector<1x16xf32> to vector<256x16xf32>
    %22 = arith.addf %19, %21 : vector<256x16xf32>
    %c224 = arith.constant 224 : index
    %c0_13 = arith.constant 0 : index
    %23 = vector.load %arg2[%c224, %c0_13] : memref<384x128xbf16, #tpu.memory_space<vmem>>, vector<32x128xbf16>
    %cst_14 = arith.constant dense<0.000000e+00> : vector<256x128xf32>
    %24 = tpu.matmul %17, %23, %cst_14 {dimension_numbers = #tpu.dot_dimension_numbers<[1], [0], [0], [1], [0, 0, 1, 1], [], []>} : vector<256x32xbf16>, vector<32x128xbf16>, vector<256x128xf32> -> vector<256x128xf32>
    %c3 = arith.constant 3 : index
    %c0_15 = arith.constant 0 : index
    %25 = vector.load %arg3[%c3, %c0_15] : memref<8x128xf32, #tpu.memory_space<vmem>>, vector<1x128xf32>
    %26 = vector.broadcast %25 : vector<1x128xf32> to vector<256x128xf32>
    %27 = arith.addf %24, %26 : vector<256x128xf32>
    %cst_16 = arith.constant 0.000000e+00 : f32
    %28 = vector.broadcast %cst_16 : f32 to vector<256x128xf32>
    %29 = arith.maximumf %27, %28 : vector<256x128xf32>
    %30 = arith.truncf %29 : vector<256x128xf32> to vector<256x128xbf16>
    %c256 = arith.constant 256 : index
    %c0_17 = arith.constant 0 : index
    %31 = vector.load %arg2[%c256, %c0_17] : memref<384x128xbf16, #tpu.memory_space<vmem>>, vector<128x64xbf16>
    %cst_18 = arith.constant dense<0.000000e+00> : vector<256x64xf32>
    %32 = tpu.matmul %30, %31, %cst_18 {dimension_numbers = #tpu.dot_dimension_numbers<[1], [0], [0], [1], [0, 0, 1, 1], [], []>} : vector<256x128xbf16>, vector<128x64xbf16>, vector<256x64xf32> -> vector<256x64xf32>
    %c4 = arith.constant 4 : index
    %c0_19 = arith.constant 0 : index
    %33 = vector.load %arg3[%c4, %c0_19] : memref<8x128xf32, #tpu.memory_space<vmem>>, vector<1x64xf32>
    %34 = vector.broadcast %33 : vector<1x64xf32> to vector<256x64xf32>
    %35 = arith.addf %32, %34 : vector<256x64xf32>
    %36 = arith.negf %35 : vector<256x64xf32>
    %37 = math.exp %36 : vector<256x64xf32>
    %cst_20 = arith.constant 1.000000e+00 : f32
    %38 = vector.broadcast %cst_20 : f32 to vector<256x64xf32>
    %39 = arith.addf %38, %37 : vector<256x64xf32>
    %40 = arith.divf %38, %39 : vector<256x64xf32>
    %cst_21 = arith.constant 0.000000e+00 : f32
    %41 = vector.broadcast %cst_21 : f32 to vector<256x48xf32>
    %42 = tpu.concatenate %40, %22, %41 in 1 : vector<256x64xf32>, vector<256x16xf32>, vector<256x48xf32> -> vector<256x128xf32>
    %c0_22 = arith.constant 0 : index
    %c0_23 = arith.constant 0 : index
    %43 = vector.load %arg4[%c0_22, %c0_23] : memref<256x128xf32, #tpu.memory_space<vmem>>, vector<256x128xf32>
    tpu.vector_store %arg4[%c0_22, %c0_23], %42 {strides = array<i32>} : memref<256x128xf32, #tpu.memory_space<vmem>>, vector<256x128xf32>,
    return
  }
  func.func @transform_0(%arg0: i32) -> (i32, i32) {
    %c0_i32 = arith.constant 0 : i32
    %c0_i32_0 = arith.constant 0 : i32
    return %arg0, %c0_i32 : i32, i32
  }
  func.func @transform_1(%arg0: i32) -> (i32, i32) {
    %c0_i32 = arith.constant 0 : i32
    %c0_i32_0 = arith.constant 0 : i32
    %c0_i32_1 = arith.constant 0 : i32
    return %c0_i32, %c0_i32_0 : i32, i32
  }
  func.func @transform_2(%arg0: i32) -> (i32, i32) {
    %c0_i32 = arith.constant 0 : i32
    %c0_i32_0 = arith.constant 0 : i32
    %c0_i32_1 = arith.constant 0 : i32
    return %c0_i32, %c0_i32_0 : i32, i32
  }
  func.func @transform_3(%arg0: i32) -> (i32, i32) {
    %c0_i32 = arith.constant 0 : i32
    %c0_i32_0 = arith.constant 0 : i32
    return %arg0, %c0_i32 : i32, i32
  }
}

</mosaic_0001>

<bundles_post_ra>
// kernel: tpu_custom_call.1
= control target key start
LH: loop header
LB: loop body
LE: loop exit
PB: predicated region body
PF: predicated region fallthrough
CT: control target
= control target key end

     0   :  { %8 = vsyncpa [#allocation3], 0  ;;  %s3353_s0 = inlined_call_operand.vmem [shape: f32[512,64], index: 0, kind: input, shape index: {}]   ;;  %s3354_s1 = inlined_call_operand.vmem [shape: bf16[384,128], index: 1, kind: input, shape index: {}]   ;;  %s3355_s2 = inlined_call_operand.vmem [shape: f32[8,128], index: 2, kind: input, shape index: {}]   ;;  %s3356_s3 = inlined_call_operand.hbm [shape: f32[512,128], index: 3, kind: output, shape index: {}]  }
   0x1   :  { %10 = vsyncpa [#allocation3 + $0x1], 0  ;;  %s2700_s12 = smov 0   ;;  %s2702_s13 = smov 0  }
   0x2   :  { %s2704_s14 = smov 0   ;;  %s2706_s15 = smov 0  }
   0x3 LB: > { %s2721_s16 = sadd.s32 4294967295, %s2674_s15   ;;  %s1978_s17 = sadd.s32 4294967294, %s2674_s15   ;;  %s2674_s15 = sphi %s2706_s15, %s3362_s15   ;;  %s2670_s14 = sphi %s2704_s14, %s3361_s14   ;;  %s2666_s13 = sphi %s2702_s13, %s3360_s13   ;;  %s2662_s12 = sphi %s2700_s12, %s3359_s12  }
   0x4   : > { %s2725_s18 = sadd.s32 1, %s2674_s15   ;;  %s91_s19 = sadd.s32 1, %s2670_s14 }
   0x5   : > { %s88_s20 = ssub.s32 %s2674_s15, %s2725_s18  ;;  %p101_p0 = scmp.ne.s32.totalorder %s2670_s14, %s2666_s13 }
   0x6   : > { %p89_p1 = scmp.eq.s32.totalorder %s88_s20, 0  ;;  %p102_p2 = scmp.eq.s32.totalorder %s2721_s16, 1 }
   0x7   : > { %p107_p3 = scmp.ne.s32.totalorder %s2666_s13, %s2662_s12  ;;  %p108_p4 = scmp.eq.s32.totalorder %s1978_s17, 1 }
   0x8   : > { %s2736_s21 = scalar_select %p89_p1, %s2670_s14, %s91_s19  }
   0x9   : > { %p2738_p5 = por %p102_p2, %p101_p0  ;;  %p2742_p6 = por %p108_p4, %p107_p3 }
   0xa   : > { %p1981_p7 = scmp.ge.s32.totalorder %s2674_s15, 1  ;;  %p141_p8 = scmp.lt.s32.totalorder %s2674_s15, 3 }
   0xc   : > { %p142_p9 = pnand %p1981_p7, %p141_p8 }
   0xd   : > { %s1983_s26 = sshll.u32 (!%p142_p9), %s2721_s16, 5  ;;  %s2099_s10 = sshll.u32 (!%p142_p9), %s2721_s16, 12 }
   0xe   : > { %145 = sbr.rel (%p142_p9) target bundleno = 960 (0x3c0), region = 32  ;;  %p166_p10 = scmp.lt.s32.totalorder (!%p142_p9), %s1983_s26, 63 }
   0xf   : > { %s3303_s20 = scalar_lea.hbm (!%p142_p9), %s3356_s3, %s2099_s10  ;;  %s2677_s25 = smov (!%p142_p9), [#allocation2]  }
  0x13   : > { %v2462_v0 = vld [vmem:[%s3354_s1 + $0x18] sm:$0xff]   ;;  %v2463_v1 = vld [vmem:[%s3354_s1 + $0x10] sm:$0xff]   ;;  %s3364_s26 = smov (!%p166_p10, %s1983_s26), 63  ;;  %v2464_v2 = vld [vmem:[%s3354_s1 + $0x8] sm:$0xff]   ;;  %vm258_vm0 = vcmask 523264   ;;  %vm815_vm1 = vcmask 261120  }
  0x14   : > { %2204 = vmatprep.subr.bf16.mxu0 %v2462_v0  ;;  %2412 = vmatprep.subr.bf16.mxu1 %v2462_v0  ;;  %s1984_s4 = sshll.u32 %s3364_s26, 3  ;;  %v2465_v5 = vld [vmem:[%s3354_s1] sm:$0xff]   ;;  %v2466_v7 = vld [vmem:[%s3354_s1 + $0x58] sm:$0xff]   ;;  %v2467_v23 = vld [vmem:[%s3354_s1 + $0x50] sm:$0xff]   ;;  %vm1837_vm2 = vcmask 654336   ;;  %s2618_s26 = sshll.u32 %s2677_s25, 4  ;;  %s2619_s26 = int_to_ptr.vmem [resolvable:$false] %s2618_s26 }
  0x15   : > { %2205 = vmatpush3.bf16.msra.mxu0 %v2462_v0  ;;  %2416 = vmatpush3.bf16.msra.mxu1 %v2462_v0  ;;  %s2761_s7 = scalar_lea.vmem %s3353_s0, %s1984_s4  ;;  %v2468_v32 = vld [vmem:[%s3354_s1 + $0x48] sm:$0xff]   ;;  %v2469_v37 = vld [vmem:[%s3354_s1 + $0x40] sm:$0xff]   ;;  %v2470_v46 = vld [vmem:[%s3354_s1 + $0x38] sm:$0xff]   ;;  %s2676_s4 = smov 64  }
  0x16   : > { %2206 = vmatprep.subr.bf16.mxu0 %v2463_v1  ;;  %2413 = vmatprep.subr.bf16.mxu1 %v2463_v1  ;;  %v173_v3 = vld [vmem:[%s2761_s7] sm:$0xff]  ;;  %v174_v4 = vld [vmem:[%s2761_s7 + $0x8] sm:$0xff]  ;;  %v175_v8 = vld [vmem:[%s2761_s7 + $0x10] sm:$0xff]  ;;  %s2620_s27 = scalar_lea.vmem %s2619_s26, 8192 }
  0x17   : > { %v205_v6 = vpack.c.bf16 %v174_v4, %v173_v3  ;;  %v176_v9 = vld [vmem:[%s2761_s7 + $0x18] sm:$0xff]  ;;  %v177_v10 = vld [vmem:[%s2761_s7 + $0x20] sm:$0xff]  ;;  %v178_v11 = vld [vmem:[%s2761_s7 + $0x28] sm:$0xff] }
  0x18   : > { %v189_v12 = vld [vmem:[%s2761_s7 + $0x80] sm:$0xff]  ;;  %v190_v13 = vld [vmem:[%s2761_s7 + $0x88] sm:$0xff]  ;;  %v191_v15 = vld [vmem:[%s2761_s7 + $0x90] sm:$0xff]  ;;  %v206_v18 = vpack.c.bf16 %v176_v9, %v175_v8  ;;  %v207_v21 = vpack.c.bf16 %v178_v11, %v177_v10 }
  0x19   : > { %2207 = vmatpush3.bf16.msra.mxu0 %v2463_v1  ;;  %2417 = vmatpush3.bf16.msra.mxu1 %v2463_v1  ;;  %v213_v14 = vpack.c.bf16 %v190_v13, %v189_v12  ;;  %v192_v16 = vld [vmem:[%s2761_s7 + $0x98] sm:$0xff]  ;;  %v193_v17 = vld [vmem:[%s2761_s7 + $0xa0] sm:$0xff]  ;;  %v194_v20 = vld [vmem:[%s2761_s7 + $0xa8] sm:$0xff] }
  0x1a   : > { %2208 = vmatprep.subr.bf16.mxu0 %v2464_v2  ;;  %2414 = vmatprep.subr.bf16.mxu1 %v2464_v2  ;;  %v214_v19 = vpack.c.bf16 %v192_v16, %v191_v15  ;;  %v215_v22 = vpack.c.bf16 %v194_v20, %v193_v17  ;;  %v179_v24 = vld [vmem:[%s2761_s7 + $0x30] sm:$0xff]  ;;  %v180_v25 = vld [vmem:[%s2761_s7 + $0x38] sm:$0xff]  ;;  %v181_v28 = vld [vmem:[%s2761_s7 + $0x40] sm:$0xff] }
  0x1b   : > { %2212 = vmatprep.mubr.msk.bf16.mxu0 %vm258_vm0, %v205_v6  ;;  %2228 = vmatprep.mubr.msk.bf16.mxu1 %vm258_vm0, %v213_v14  ;;  %v195_v26 = vld [vmem:[%s2761_s7 + $0xb0] sm:$0xff]  ;;  %v196_v27 = vld [vmem:[%s2761_s7 + $0xb8] sm:$0xff]  ;;  %v182_v29 = vld [vmem:[%s2761_s7 + $0x48] sm:$0xff]  ;;  %v208_v33 = vpack.c.bf16 %v180_v25, %v179_v24 }
  0x1c   : > { %v197_v30 = vld [vmem:[%s2761_s7 + $0xc0] sm:$0xff]  ;;  %v198_v31 = vld [vmem:[%s2761_s7 + $0xc8] sm:$0xff]  ;;  %v216_v34 = vpack.c.bf16 %v196_v27, %v195_v26  ;;  %v209_v35 = vpack.c.bf16 %v182_v29, %v181_v28  ;;  %v183_v38 = vld [vmem:[%s2761_s7 + $0x50] sm:$0xff] }
  0x1d   : > { %2209 = vmatpush3.bf16.msra.mxu0 %v2464_v2  ;;  %2418 = vmatpush3.bf16.msra.mxu1 %v2464_v2  ;;  %v217_v36 = vpack.c.bf16 %v198_v31, %v197_v30  ;;  %v184_v39 = vld [vmem:[%s2761_s7 + $0x58] sm:$0xff]  ;;  %v199_v40 = vld [vmem:[%s2761_s7 + $0xd0] sm:$0xff]  ;;  %v185_v42 = vld [vmem:[%s2761_s7 + $0x60] sm:$0xff] }
  0x1e   : > { %2210 = vmatprep.subr.bf16.mxu0 %v2465_v5  ;;  %2415 = vmatprep.subr.bf16.mxu1 %v2465_v5  ;;  %v200_v41 = vld [vmem:[%s2761_s7 + $0xd8] sm:$0xff]  ;;  %v186_v43 = vld [vmem:[%s2761_s7 + $0x68] sm:$0xff]  ;;  %v201_v44 = vld [vmem:[%s2761_s7 + $0xe0] sm:$0xff]  ;;  %v210_v47 = vpack.c.bf16 %v184_v39, %v183_v38 }
  0x1f   : > { %v202_v45 = vld [vmem:[%s2761_s7 + $0xe8] sm:$0xff]  ;;  %v218_v48 = vpack.c.bf16 %v200_v41, %v199_v40  ;;  %v211_v49 = vpack.c.bf16 %v186_v43, %v185_v42  ;;  %v187_v51 = vld [vmem:[%s2761_s7 + $0x70] sm:$0xff]  ;;  %v188_v52 = vld [vmem:[%s2761_s7 + $0x78] sm:$0xff] }
  0x20   : > { %v219_v50 = vpack.c.bf16 %v202_v45, %v201_v44  ;;  %v203_v53 = vld [vmem:[%s2761_s7 + $0xf0] sm:$0xff]  ;;  %v204_v54 = vld [vmem:[%s2761_s7 + $0xf8] sm:$0xff]  ;;  %v212_v55 = vpack.c.bf16 %v188_v52, %v187_v51  ;;  %v2472_v58 = vld [vmem:[%s3354_s1 + $0x28] sm:$0xff]   ;;  %s162_s7 = sand.u32 1, %s2666_s13  }
  0x21   : > { %2211 = vmatpush3.bf16.msra.mxu0 %v2465_v5  ;;  %2419 = vmatpush3.bf16.msra.mxu1 %v2465_v5  ;;  %v220_v56 = vpack.c.bf16 %v204_v54, %v203_v53  ;;  %v2471_v57 = vld [vmem:[%s3354_s1 + $0x30] sm:$0xff]   ;;  %v2473_v59 = vld [vmem:[%s3354_s1 + $0x20] sm:$0xff]   ;;  %v2474_v60 = vld [vmem:[%s3354_s1 + $0x78] sm:$0xff]   ;;  %s1982_s8 = sshll.u32 %s162_s7, 8  ;;  %s3313_s16 = scalar_lea.sflag [#allocation3], %s162_s7 }
  0x22   : > { %2244 = vmatprep.subr.bf16.mxu1 %v2466_v7  ;;  %v2846_v1 = vld [vmem:[%s3355_s2] ss:$0 sm:$0xff]  ;;  %s3159_s9 = scalar_lea.vmem [#allocation2], %s1982_s8 }
  0x23   : > { %s1916_s11 = sshll.u32 %s3159_s9, 4  ;;  %s3305_s11 = int_to_ptr.vmem [resolvable:$true] %s1916_s11 }
  0x24   : > { %2213 = vmatmul.mubr.msk.bf16.vlgmr.msra.gmra.mxu0 %vm258_vm0, %v206_v18  ;;  %2229 = vmatmul.mubr.msk.bf16.vlgmr.msra.gmra.mxu1 %vm258_vm0, %v214_v19  ;;  %s2614_s24 = scalar_lea.vmem %s3305_s11, 4096  ;;  %p2621_p0 = scmp.lt.s32.totalorder %s3305_s11, %s2619_s26 }
  0x25   : > { %2216 = vmatprep.mubr.msk.bf16.mxu0 %vm258_vm0, %v207_v21  ;;  %2232 = vmatprep.mubr.msk.bf16.mxu1 %vm258_vm0, %v215_v22  ;;  %v2475_v22 = vld [vmem:[%s3354_s1 + $0x70] sm:$0xff]   ;;  %p2615_p11 = scmp.ne.s32.totalorder %s3305_s11, %s2614_s24  ;;  %p2622_p1 = scmp.lt.s32.totalorder %s2620_s27, %s2614_s24 }
  0x26   : > { %2245 = vmatpush3.bf16.msra.mxu1 %v2466_v7 }
  0x27   : > { %2246 = vmatprep.subr.bf16.mxu1 %v2467_v23  ;;  %p2616_p12 = pnand %p2615_p11, %p2738_p5  ;;  %p2623_p2 = por %p2622_p1, %p2621_p0 }
  0x29   : > { %p2617_p13 = pneg %p2616_p12 }
  0x2a   : > { %2247 = vmatpush3.bf16.msra.mxu1 %v2467_v23 }
  0x2b   : > { %2248 = vmatprep.subr.bf16.mxu1 %v2468_v32  ;;  %p2624_p3 = pnand %p2623_p2, %p2617_p13 }
  0x2c   : > { %2217 = vmatmul.mubr.msk.bf16.gmra.mxu0 %vm258_vm0, %v208_v33  ;;  %2233 = vmatmul.mubr.msk.bf16.gmra.mxu1 %vm258_vm0, %v216_v34 }
  0x2d   : > { %2220 = vmatprep.mubr.msk.bf16.mxu0 %vm258_vm0, %v209_v35  ;;  %2236 = vmatprep.mubr.msk.bf16.mxu1 %vm258_vm0, %v217_v36 }
  0x2e   : > { %2249 = vmatpush3.bf16.msra.mxu1 %v2468_v32 }
  0x2f   : > { %2250 = vmatprep.subr.bf16.mxu1 %v2469_v37 }
  0x32   : > { %2251 = vmatpush3.bf16.msra.mxu1 %v2469_v37 }
  0x33   : > { %2252 = vmatprep.subr.bf16.mxu1 %v2470_v46 }
  0x34   : > { %2221 = vmatmul.mubr.msk.bf16.gmra.mxu0 %vm258_vm0, %v210_v47  ;;  %2237 = vmatmul.mubr.msk.bf16.gmra.mxu1 %vm258_vm0, %v218_v48 }
  0x35   : > { %2224 = vmatprep.mubr.msk.bf16.mxu0 %vm258_vm0, %v211_v49  ;;  %2240 = vmatprep.mubr.msk.bf16.mxu1 %vm258_vm0, %v219_v50 }
  0x36   : > { %2253 = vmatpush3.bf16.msra.mxu1 %v2470_v46 }
  0x37   : > { %2254 = vmatprep.subr.bf16.mxu1 %v2471_v57 }
  0x3a   : > { %2255 = vmatpush3.bf16.msra.mxu1 %v2471_v57 }
  0x3b   : > { %2256 = vmatprep.subr.bf16.mxu1 %v2472_v58 }
  0x3c   : > { %2225 = vmatmul.mubr.msk.bf16.gmra.mxu0 %vm258_vm0, %v212_v55  ;;  %2241 = vmatmul.mubr.msk.bf16.gmra.mxu1 %vm258_vm0, %v220_v56 }
  0x3e   : > { %2257 = vmatpush3.bf16.msra.mxu1 %v2472_v58 }
  0x3f   : > { %2258 = vmatprep.subr.bf16.mxu1 %v2473_v59 }
  0x42   : > { %2259 = vmatpush3.bf16.msra.mxu1 %v2473_v59 }
  0x43   : > { %2328 = vmatprep.subr.bf16.mxu1 %v2474_v60 }
  0xe4   : > { %v2214_v61 = vpop.f32.mrf.mxu0  ;;  %v2841_v62 = vpop.f32.mrf.mxu1 }
  0xe5   : > { %v350_v6 = vadd.f32 %v2214_v61, %v2846_v1 }
  0xe6   : > { %v341_v63 = vpop.f32.mrf.mxu0  ;;  %v405_v0 = vpop.f32.mrf.mxu1 }
  0xe7   : > { %v342_v4 = vadd.f32 %v2846_v1, %v341_v63  ;;  %v470_v15 = vmax.f32 %v350_v6, 0.0  ;;  %v406_v52 = vadd.f32 %v2846_v1, %v405_v0 }
  0xe8   : > { %v2215_v2 = vpop.f32.mrf.mxu0  ;;  %v2848_v3 = vpop.f32.mrf.mxu1 }
  0xe9   : > { %v353_v5 = vadd.f32 %v2215_v2, %v2846_v1  ;;  %v468_v13 = vmax.f32 %v342_v4, 0.0  ;;  %v484_v61 = vmax.f32 %v406_v52, 0.0  ;;  %v2911_v52 = vld [vmem:[%s3355_s2 + $0x1] ss:$0 sm:$0xff] }
  0xea   : > { %v344_v7 = vpop.f32.mrf.mxu0  ;;  %v408_v8 = vpop.f32.mrf.mxu1 }
  0xeb   : > { %v345_v9 = vadd.f32 %v2846_v1, %v344_v7  ;;  %v471_v10 = vmax.f32 %v353_v5, 0.0  ;;  %v409_v53 = vadd.f32 %v2846_v1, %v408_v8 }
  0xec   : > { %v2218_v11 = vpop.f32.mrf.mxu0  ;;  %v2854_v12 = vpop.f32.mrf.mxu1 }
  0xed   : > { %v469_v14 = vmax.f32 %v345_v9, 0.0  ;;  %v501_v19 = vpack.c.bf16 %v471_v10, %v470_v15  ;;  %v366_v25 = vadd.f32 %v2218_v11, %v2846_v1  ;;  %v485_v2 = vmax.f32 %v409_v53, 0.0 }
  0xee   : > { %v357_v16 = vpop.f32.mrf.mxu0  ;;  %v2856_v17 = vpop.f32.mrf.mxu1  ;;  %v417_v15 = vadd.f32 %v2848_v3, %v2846_v1 }
  0xef   : > { %v500_v18 = vpack.c.bf16 %v469_v14, %v468_v13  ;;  %v358_v23 = vadd.f32 %v2846_v1, %v357_v16  ;;  %v474_v33 = vmax.f32 %v366_v25, 0.0  ;;  %v508_v9 = vpack.c.bf16 %v485_v2, %v484_v61 }
  0xf0   : > { %v2219_v20 = vpop.f32.mrf.mxu0  ;;  %v2858_v21 = vpop.f32.mrf.mxu1  ;;  %v422_v10 = vadd.f32 %v2846_v1, %v2856_v17  ;;  %v414_v13 = vadd.f32 %v2841_v62, %v2846_v1  ;;  %v430_v62 = vadd.f32 %v2854_v12, %v2846_v1 }
  0xf1   : > { %v369_v24 = vadd.f32 %v2219_v20, %v2846_v1  ;;  %2260 = vmatprep.mubr.bf16.mxu1 %v500_v18  ;;  %v472_v31 = vmax.f32 %v358_v23, 0.0  ;;  %v433_v3 = vadd.f32 %v2858_v21, %v2846_v1 }
  0xf2   : > { %v360_v26 = vpop.f32.mrf.mxu0  ;;  %2261 = vmatmul.mubr.bf16.vlgmr.msra.gmra.mxu1 %v501_v19  ;;  %v424_v30 = vpop.f32.mrf.mxu1  ;;  %v488_v18 = vmax.f32 %v422_v10, 0.0  ;;  %v486_v20 = vmax.f32 %v414_v13, 0.0 }
  0xf3   : > { %v361_v27 = vadd.f32 %v2846_v1, %v360_v26  ;;  %2329 = vmatpush3.bf16.msra.mxu1 %v2474_v60  ;;  %v475_v28 = vmax.f32 %v369_v24, 0.0  ;;  %v425_v11 = vadd.f32 %v2846_v1, %v424_v30  ;;  %v490_v30 = vmax.f32 %v430_v62, 0.0 }
  0xf4   : > { %v2222_v29 = vpop.f32.mrf.mxu0  ;;  %2330 = vmatprep.subr.bf16.mxu1 %v2475_v22  ;;  %v2867_v38 = vpop.f32.mrf.mxu1 }
  0xf5   : > { %v473_v32 = vmax.f32 %v361_v27, 0.0  ;;  %v503_v36 = vpack.c.bf16 %v475_v28, %v474_v33  ;;  %v382_v41 = vadd.f32 %v2222_v29, %v2846_v1  ;;  %v489_v19 = vmax.f32 %v425_v11, 0.0 }
  0xf6   : > { %v373_v34 = vpop.f32.mrf.mxu0  ;;  %v437_v46 = vpop.f32.mrf.mxu1  ;;  %v446_v12 = vadd.f32 %v2867_v38, %v2846_v1  ;;  %v2476_v38 = vld [vmem:[%s3354_s1 + $0x68] sm:$0xff]  }
  0xf7   : > { %v502_v35 = vpack.c.bf16 %v473_v32, %v472_v31  ;;  %2331 = vmatpush3.bf16.msra.mxu1 %v2475_v22  ;;  %v374_v39 = vadd.f32 %v2846_v1, %v373_v34  ;;  %v478_v49 = vmax.f32 %v382_v41, 0.0  ;;  %v487_v22 = vmax.f32 %v417_v15, 0.0  ;;  %2292 = vmatprep.subr.bf16.mxu0 %v2476_v38 }
  0xf8   : > { %v2223_v37 = vpop.f32.mrf.mxu0  ;;  %v2239_v56 = vpop.f32.mrf.mxu1  ;;  %v510_v24 = vpack.c.bf16 %v489_v19, %v488_v18  ;;  %v438_v17 = vadd.f32 %v2846_v1, %v437_v46  ;;  %v491_v31 = vmax.f32 %v433_v3, 0.0  ;;  %2293 = vmatpush3.bf16.msra.mxu0 %v2476_v38 }
  0xf9   : > { %v385_v40 = vadd.f32 %v2223_v37, %v2846_v1  ;;  %2264 = vmatprep.mubr.bf16.mxu1 %v502_v35  ;;  %v476_v47 = vmax.f32 %v374_v39, 0.0  ;;  %v509_v26 = vpack.c.bf16 %v487_v22, %v486_v20  ;;  %v449_v37 = vadd.f32 %v2239_v56, %v2846_v1 }
  0xfa   : > { %v376_v42 = vpop.f32.mrf.mxu0  ;;  %2265 = vmatmul.mubr.bf16.gmra.mxu1 %v503_v36  ;;  %v440_v0 = vpop.f32.mrf.mxu1  ;;  %v492_v28 = vmax.f32 %v438_v17, 0.0  ;;  %v511_v36 = vpack.c.bf16 %v491_v31, %v490_v30  ;;  %v2482_v31 = vld [vmem:[%s3354_s1 + $0x98] sm:$0xff]  }
  0xfb   : > { %v377_v43 = vadd.f32 %v2846_v1, %v376_v42  ;;  %v479_v44 = vmax.f32 %v385_v40, 0.0  ;;  %v441_v25 = vadd.f32 %v2846_v1, %v440_v0  ;;  %v494_v40 = vmax.f32 %v446_v12, 0.0 }
  0xfc   : > { %v2226_v45 = vpop.f32.mrf.mxu0  ;;  %v2242_v16 = vpop.f32.mrf.mxu1  ;;  %v495_v41 = vmax.f32 %v449_v37, 0.0 }
  0xfd   : > { %v477_v48 = vmax.f32 %v377_v43, 0.0  ;;  %v505_v54 = vpack.c.bf16 %v479_v44, %v478_v49  ;;  %v398_v59 = vadd.f32 %v2226_v45, %v2846_v1  ;;  %v493_v29 = vmax.f32 %v441_v25, 0.0  ;;  %v2477_v49 = vld [vmem:[%s3354_s1 + $0x60] sm:$0xff]  }
  0xfe   : > { %v389_v50 = vpop.f32.mrf.mxu0  ;;  %v453_v23 = vpop.f32.mrf.mxu1  ;;  %v513_v43 = vpack.c.bf16 %v495_v41, %v494_v40  ;;  %v462_v44 = vadd.f32 %v2242_v16, %v2846_v1  ;;  %2294 = vmatprep.subr.bf16.mxu0 %v2477_v49  ;;  %v2480_v16 = vld [vmem:[%s3354_s1 + $0xa8] sm:$0xff]   ;;  %v2481_v25 = vld [vmem:[%s3354_s1 + $0xa0] sm:$0xff]  }
  0xff   : > { %v504_v51 = vpack.c.bf16 %v477_v48, %v476_v47  ;;  %v390_v57 = vadd.f32 %v2846_v1, %v389_v50  ;;  %v482_v7 = vmax.f32 %v398_v59, 0.0  ;;  %v512_v33 = vpack.c.bf16 %v493_v29, %v492_v28  ;;  %2295 = vmatpush3.bf16.msra.mxu0 %v2477_v49 }
 0x100   : > { %v2227_v55 = vpop.f32.mrf.mxu0  ;;  %v2243_v27 = vpop.f32.mrf.mxu1  ;;  %v454_v34 = vadd.f32 %v2846_v1, %v453_v23  ;;  %v498_v46 = vmax.f32 %v462_v44, 0.0 }
 0x101   : > { %v401_v58 = vadd.f32 %v2227_v55, %v2846_v1  ;;  %2268 = vmatprep.mubr.bf16.mxu1 %v504_v51  ;;  %v480_v5 = vmax.f32 %v390_v57, 0.0  ;;  %v465_v45 = vadd.f32 %v2243_v27, %v2846_v1 }
 0x102   : > { %v392_v60 = vpop.f32.mrf.mxu0  ;;  %2269 = vmatmul.mubr.bf16.gmra.mxu1 %v505_v54  ;;  %v456_v32 = vpop.f32.mrf.mxu1  ;;  %v496_v21 = vmax.f32 %v454_v34, 0.0 }
 0x103   : > { %v393_v63 = vadd.f32 %v2846_v1, %v392_v60  ;;  %v483_v4 = vmax.f32 %v401_v58, 0.0  ;;  %v457_v35 = vadd.f32 %v2846_v1, %v456_v32  ;;  %v499_v47 = vmax.f32 %v465_v45, 0.0  ;;  %v2478_v1 = vld [vmem:[%s3354_s1 + $0xb8] sm:$0xff]  }
 0x104   : > { %2364 = vmatprep.subr.bf16.mxu0 %v2478_v1 }
 0x105   : > { %v481_v6 = vmax.f32 %v393_v63, 0.0  ;;  %v507_v14 = vpack.c.bf16 %v483_v4, %v482_v7  ;;  %v497_v39 = vmax.f32 %v457_v35, 0.0  ;;  %v515_v48 = vpack.c.bf16 %v499_v47, %v498_v46  ;;  %v2479_v7 = vld [vmem:[%s3354_s1 + $0xb0] sm:$0xff]   ;;  %v2484_v46 = vld [vmem:[%s3354_s1 + $0x88] sm:$0xff]  }
 0x107   : > { %v506_v8 = vpack.c.bf16 %v481_v6, %v480_v5  ;;  %v514_v42 = vpack.c.bf16 %v497_v39, %v496_v21  ;;  %v2483_v21 = vld [vmem:[%s3354_s1 + $0x90] sm:$0xff]  }
 0x109   : > { %2272 = vmatprep.mubr.bf16.mxu1 %v506_v8 }
 0x10a   : > { %2273 = vmatmul.mubr.bf16.gmra.mxu1 %v507_v14 }
 0x10b   : > { %2276 = vmatprep.mubr.bf16.mxu1 %v508_v9 }
 0x112   : > { %2277 = vmatmul.mubr.bf16.gmra.mxu1 %v509_v26 }
 0x113   : > { %2280 = vmatprep.mubr.bf16.mxu1 %v510_v24 }
 0x11a   : > { %2281 = vmatmul.mubr.bf16.gmra.mxu1 %v511_v36 }
 0x11b   : > { %2284 = vmatprep.mubr.bf16.mxu1 %v512_v33 }
 0x122   : > { %2285 = vmatmul.mubr.bf16.gmra.mxu1 %v513_v43 }
 0x123   : > { %2288 = vmatprep.mubr.bf16.mxu1 %v514_v42 }
 0x12a   : > { %2289 = vmatmul.mubr.bf16.gmra.mxu1 %v515_v48 }
 0x1b2   : > { %v2262_v50 = vpop.f32.mrf.mxu1 }
 0x1b3   : > { %v628_v56 = vadd.f32 %v2262_v50, %v2911_v52 }
 0x1b4   : > { %v619_v51 = vpop.f32.mrf.mxu1 }
 0x1b5   : > { %v620_v54 = vadd.f32 %v2911_v52, %v619_v51  ;;  %v748_v2 = vmax.f32 %v628_v56, 0.0 }
 0x1b6   : > { %v2263_v53 = vpop.f32.mrf.mxu1 }
 0x1b7   : > { %v631_v55 = vadd.f32 %v2263_v53, %v2911_v52  ;;  %v746_v61 = vmax.f32 %v620_v54, 0.0 }
 0x1b8   : > { %v622_v57 = vpop.f32.mrf.mxu1 }
 0x1b9   : > { %v623_v58 = vadd.f32 %v2911_v52, %v622_v57  ;;  %v749_v59 = vmax.f32 %v631_v55, 0.0 }
 0x1ba   : > { %v2266_v60 = vpop.f32.mrf.mxu1 }
 0x1bb   : > { %v747_v63 = vmax.f32 %v623_v58, 0.0  ;;  %v779_v5 = vpack.c.bf16 %v749_v59, %v748_v2  ;;  %v644_v10 = vadd.f32 %v2266_v60, %v2911_v52 }
 0x1bc   : > { %v635_v4 = vpop.f32.mrf.mxu1 }
 0x1bd   : > { %v778_v0 = vpack.c.bf16 %v747_v63, %v746_v61  ;;  %v636_v8 = vadd.f32 %v2911_v52, %v635_v4  ;;  %v752_v20 = vmax.f32 %v644_v10, 0.0 }
 0x1be   : > { %v2267_v6 = vpop.f32.mrf.mxu1 }
 0x1bf   : > { %v647_v9 = vadd.f32 %v2267_v6, %v2911_v52  ;;  %2296 = vmatprep.mubr.msk.bf16.mxu0 %vm815_vm1, %v778_v0  ;;  %2332 = vmatprep.mubr.msk.bf16.mxu1 %vm815_vm1, %v778_v0  ;;  %v750_v18 = vmax.f32 %v636_v8, 0.0 }
 0x1c0   : > { %v638_v11 = vpop.f32.mrf.mxu1  ;;  %2297 = vmatmul.mubr.msk.bf16.vlgmr.msra.gmra.mxu0 %vm815_vm1, %v779_v5  ;;  %2333 = vmatmul.mubr.msk.bf16.vlgmr.msra.gmra.mxu1 %vm815_vm1, %v779_v5 }
 0x1c1   : > { %v639_v13 = vadd.f32 %v2911_v52, %v638_v11  ;;  %2365 = vmatpush3.bf16.msra.mxu0 %v2478_v1  ;;  %v753_v14 = vmax.f32 %v647_v9, 0.0 }
 0x1c2   : > { %v2270_v15 = vpop.f32.mrf.mxu1  ;;  %2366 = vmatprep.subr.bf16.mxu0 %v2479_v7 }
 0x1c3   : > { %v751_v19 = vmax.f32 %v639_v13, 0.0  ;;  %v781_v24 = vpack.c.bf16 %v753_v14, %v752_v20  ;;  %v660_v3 = vadd.f32 %v2270_v15, %v2911_v52 }
 0x1c4   : > { %v651_v22 = vpop.f32.mrf.mxu1 }
 0x1c5   : > { %v780_v23 = vpack.c.bf16 %v751_v19, %v750_v18  ;;  %2367 = vmatpush3.bf16.msra.mxu0 %v2479_v7  ;;  %v652_v26 = vadd.f32 %v2911_v52, %v651_v22  ;;  %v756_v34 = vmax.f32 %v660_v3, 0.0 }
 0x1c6   : > { %v2271_v17 = vpop.f32.mrf.mxu1  ;;  %2368 = vmatprep.subr.bf16.mxu0 %v2480_v16 }
 0x1c7   : > { %v663_v62 = vadd.f32 %v2271_v17, %v2911_v52  ;;  %2300 = vmatprep.mubr.msk.bf16.mxu0 %vm815_vm1, %v780_v23  ;;  %2336 = vmatprep.mubr.msk.bf16.mxu1 %vm815_vm1, %v780_v23  ;;  %v754_v32 = vmax.f32 %v652_v26, 0.0 }
 0x1c8   : > { %v654_v27 = vpop.f32.mrf.mxu1  ;;  %2301 = vmatmul.mubr.msk.bf16.gmra.mxu0 %vm815_vm1, %v781_v24  ;;  %2337 = vmatmul.mubr.msk.bf16.gmra.mxu1 %vm815_vm1, %v781_v24 }
 0x1c9   : > { %v655_v28 = vadd.f32 %v2911_v52, %v654_v27  ;;  %2369 = vmatpush3.bf16.msra.mxu0 %v2480_v16  ;;  %v757_v29 = vmax.f32 %v663_v62, 0.0 }
 0x1ca   : > { %v2274_v30 = vpop.f32.mrf.mxu1  ;;  %2370 = vmatprep.subr.bf16.mxu0 %v2481_v25 }
 0x1cb   : > { %v755_v33 = vmax.f32 %v655_v28, 0.0  ;;  %v783_v12 = vpack.c.bf16 %v757_v29, %v756_v34  ;;  %v676_v41 = vadd.f32 %v2274_v30, %v2911_v52 }
 0x1cc   : > { %v667_v35 = vpop.f32.mrf.mxu1 }
 0x1cd   : > { %v782_v36 = vpack.c.bf16 %v755_v33, %v754_v32  ;;  %2371 = vmatpush3.bf16.msra.mxu0 %v2481_v25  ;;  %v668_v39 = vadd.f32 %v2911_v52, %v667_v35  ;;  %v760_v38 = vmax.f32 %v676_v41, 0.0 }
 0x1ce   : > { %v2275_v37 = vpop.f32.mrf.mxu1  ;;  %2372 = vmatprep.subr.bf16.mxu0 %v2482_v31 }
 0x1cf   : > { %v679_v40 = vadd.f32 %v2275_v37, %v2911_v52  ;;  %2304 = vmatprep.mubr.msk.bf16.mxu0 %vm815_vm1, %v782_v36  ;;  %2340 = vmatprep.mubr.msk.bf16.mxu1 %vm815_vm1, %v782_v36  ;;  %v758_v47 = vmax.f32 %v668_v39, 0.0 }
 0x1d0   : > { %v670_v42 = vpop.f32.mrf.mxu1  ;;  %2305 = vmatmul.mubr.msk.bf16.gmra.mxu0 %vm815_vm1, %v783_v12  ;;  %2341 = vmatmul.mubr.msk.bf16.gmra.mxu1 %vm815_vm1, %v783_v12 }
 0x1d1   : > { %v671_v43 = vadd.f32 %v2911_v52, %v670_v42  ;;  %2373 = vmatpush3.bf16.msra.mxu0 %v2482_v31  ;;  %v761_v44 = vmax.f32 %v679_v40, 0.0 }
 0x1d2   : > { %v2278_v45 = vpop.f32.mrf.mxu1  ;;  %2374 = vmatprep.subr.bf16.mxu0 %v2483_v21 }
 0x1d3   : > { %v759_v48 = vmax.f32 %v671_v43, 0.0  ;;  %v785_v50 = vpack.c.bf16 %v761_v44, %v760_v38  ;;  %v692_v55 = vadd.f32 %v2278_v45, %v2911_v52  ;;  %v2485_v44 = vld [vmem:[%s3354_s1 + $0x80] sm:$0xff]  }
 0x1d4   : > { %v683_v49 = vpop.f32.mrf.mxu1 }
 0x1d5   : > { %v784_v1 = vpack.c.bf16 %v759_v48, %v758_v47  ;;  %2375 = vmatpush3.bf16.msra.mxu0 %v2483_v21  ;;  %v684_v53 = vadd.f32 %v2911_v52, %v683_v49  ;;  %v764_v63 = vmax.f32 %v692_v55, 0.0  ;;  %v3007_v49 = vld [vmem:[%s3355_s2 + $0x3] ss:$0 sm:$0xff] }
 0x1d6   : > { %v2279_v51 = vpop.f32.mrf.mxu1  ;;  %2376 = vmatprep.subr.bf16.mxu0 %v2484_v46 }
 0x1d7   : > { %v695_v54 = vadd.f32 %v2279_v51, %v2911_v52  ;;  %2308 = vmatprep.mubr.msk.bf16.mxu0 %vm815_vm1, %v784_v1  ;;  %2344 = vmatprep.mubr.msk.bf16.mxu1 %vm815_vm1, %v784_v1  ;;  %v762_v60 = vmax.f32 %v684_v53, 0.0 }
 0x1d8   : > { %v686_v56 = vpop.f32.mrf.mxu1  ;;  %2309 = vmatmul.mubr.msk.bf16.gmra.mxu0 %vm815_vm1, %v785_v50  ;;  %2345 = vmatmul.mubr.msk.bf16.gmra.mxu1 %vm815_vm1, %v785_v50 }
 0x1d9   : > { %v687_v57 = vadd.f32 %v2911_v52, %v686_v56  ;;  %2377 = vmatpush3.bf16.msra.mxu0 %v2484_v46  ;;  %v765_v58 = vmax.f32 %v695_v54, 0.0 }
 0x1da   : > { %v2282_v59 = vpop.f32.mrf.mxu1  ;;  %2378 = vmatprep.subr.bf16.mxu0 %v2485_v44 }
 0x1db   : > { %v763_v61 = vmax.f32 %v687_v57, 0.0  ;;  %v787_v0 = vpack.c.bf16 %v765_v58, %v764_v63  ;;  %v708_v8 = vadd.f32 %v2282_v59, %v2911_v52 }
 0x1dc   : > { %v699_v2 = vpop.f32.mrf.mxu1 }
 0x1dd   : > { %v786_v4 = vpack.c.bf16 %v763_v61, %v762_v60  ;;  %v700_v6 = vadd.f32 %v2911_v52, %v699_v2  ;;  %v768_v16 = vmax.f32 %v708_v8, 0.0  ;;  %2379 = vmatpush3.bf16.msra.mxu0 %v2485_v44 }
 0x1de   : > { %v2283_v5 = vpop.f32.mrf.mxu1 }
 0x1df   : > { %v711_v7 = vadd.f32 %v2283_v5, %v2911_v52  ;;  %2312 = vmatprep.mubr.msk.bf16.mxu0 %vm815_vm1, %v786_v4  ;;  %2348 = vmatprep.mubr.msk.bf16.mxu1 %vm815_vm1, %v786_v4  ;;  %v766_v14 = vmax.f32 %v700_v6, 0.0 }
 0x1e0   : > { %v702_v9 = vpop.f32.mrf.mxu1  ;;  %2313 = vmatmul.mubr.msk.bf16.gmra.mxu0 %vm815_vm1, %v787_v0  ;;  %2349 = vmatmul.mubr.msk.bf16.gmra.mxu1 %vm815_vm1, %v787_v0 }
 0x1e1   : > { %v703_v10 = vadd.f32 %v2911_v52, %v702_v9  ;;  %v769_v11 = vmax.f32 %v711_v7, 0.0 }
 0x1e2   : > { %v2286_v13 = vpop.f32.mrf.mxu1 }
 0x1e3   : > { %v767_v15 = vmax.f32 %v703_v10, 0.0  ;;  %v789_v20 = vpack.c.bf16 %v769_v11, %v768_v16  ;;  %v724_v17 = vadd.f32 %v2286_v13, %v2911_v52 }
 0x1e4   : > { %v715_v18 = vpop.f32.mrf.mxu1 }
 0x1e5   : > { %v788_v19 = vpack.c.bf16 %v767_v15, %v766_v14  ;;  %v716_v23 = vadd.f32 %v2911_v52, %v715_v18  ;;  %v772_v29 = vmax.f32 %v724_v17, 0.0 }
 0x1e6   : > { %v2287_v22 = vpop.f32.mrf.mxu1 }
 0x1e7   : > { %v727_v24 = vadd.f32 %v2287_v22, %v2911_v52  ;;  %2316 = vmatprep.mubr.msk.bf16.mxu0 %vm815_vm1, %v788_v19  ;;  %2352 = vmatprep.mubr.msk.bf16.mxu1 %vm815_vm1, %v788_v19  ;;  %v770_v27 = vmax.f32 %v716_v23, 0.0 }
 0x1e8   : > { %v718_v25 = vpop.f32.mrf.mxu1  ;;  %2317 = vmatmul.mubr.msk.bf16.gmra.mxu0 %vm815_vm1, %v789_v20  ;;  %2353 = vmatmul.mubr.msk.bf16.gmra.mxu1 %vm815_vm1, %v789_v20 }
 0x1e9   : > { %v719_v26 = vadd.f32 %v2911_v52, %v718_v25  ;;  %v773_v62 = vmax.f32 %v727_v24, 0.0 }
 0x1ea   : > { %v2290_v3 = vpop.f32.mrf.mxu1 }
 0x1eb   : > { %v771_v28 = vmax.f32 %v719_v26, 0.0  ;;  %v791_v32 = vpack.c.bf16 %v773_v62, %v772_v29  ;;  %v740_v36 = vadd.f32 %v2290_v3, %v2911_v52 }
 0x1ec   : > { %v731_v30 = vpop.f32.mrf.mxu1 }
 0x1ed   : > { %v790_v31 = vpack.c.bf16 %v771_v28, %v770_v27  ;;  %v732_v34 = vadd.f32 %v2911_v52, %v731_v30  ;;  %v776_v41 = vmax.f32 %v740_v36, 0.0 }
 0x1ee   : > { %v2291_v33 = vpop.f32.mrf.mxu1 }
 0x1ef   : > { %v743_v35 = vadd.f32 %v2291_v33, %v2911_v52  ;;  %2320 = vmatprep.mubr.msk.bf16.mxu0 %vm815_vm1, %v790_v31  ;;  %2356 = vmatprep.mubr.msk.bf16.mxu1 %vm815_vm1, %v790_v31  ;;  %v774_v39 = vmax.f32 %v732_v34, 0.0 }
 0x1f0   : > { %v734_v12 = vpop.f32.mrf.mxu1  ;;  %2321 = vmatmul.mubr.msk.bf16.gmra.mxu0 %vm815_vm1, %v791_v32  ;;  %2357 = vmatmul.mubr.msk.bf16.gmra.mxu1 %vm815_vm1, %v791_v32 }
 0x1f1   : > { %v735_v37 = vadd.f32 %v2911_v52, %v734_v12  ;;  %v777_v21 = vmax.f32 %v743_v35, 0.0  ;;  %v3001_v52 = vld [vmem:[%s3355_s2 + $0x2] ss:$0 sm:$0xff] }
 0x1f3   : > { %v775_v40 = vmax.f32 %v735_v37, 0.0  ;;  %v793_v43 = vpack.c.bf16 %v777_v21, %v776_v41 }
 0x1f5   : > { %v792_v42 = vpack.c.bf16 %v775_v40, %v774_v39 }
 0x1f7   : > { %2324 = vmatprep.mubr.msk.bf16.mxu0 %vm815_vm1, %v792_v42  ;;  %2360 = vmatprep.mubr.msk.bf16.mxu1 %vm815_vm1, %v792_v42 }
 0x1f8   : > { %2325 = vmatmul.mubr.msk.bf16.gmra.mxu0 %vm815_vm1, %v793_v43  ;;  %2361 = vmatmul.mubr.msk.bf16.gmra.mxu1 %vm815_vm1, %v793_v43 }
 0x280   : > { %v2298_v45 = vpop.f32.mrf.mxu0  ;;  %v2334_v46 = vpop.f32.mrf.mxu1 }
 0x281   : > { %v907_v47 = vadd.f32 %v2298_v45, %v3001_v52  ;;  %v1089_v56 = vadd.f32 %v2334_v46, %v3007_v49 }
 0x282   : > { %v898_v48 = vpop.f32.mrf.mxu0  ;;  %v1080_v38 = vpop.f32.mrf.mxu1 }
 0x283   : > { %v899_v1 = vadd.f32 %v3001_v52, %v898_v48  ;;  %1713 = vrot.lane.b32.xlu1 %v907_v47, %s2676_s4  ;;  %v1081_v53 = vadd.f32 %v3007_v49, %v1080_v38  ;;  %v1209_v5 = vmax.f32 %v1089_v56, 0.0 }
 0x284   : > { %v2299_v50 = vpop.f32.mrf.mxu0  ;;  %v2335_v51 = vpop.f32.mrf.mxu1 }
 0x285   : > { %v910_v54 = vadd.f32 %v2299_v50, %v3001_v52  ;;  %v1092_v55 = vadd.f32 %v2335_v51, %v3007_v49  ;;  %1709 = vrot.lane.b32.xlu0 %v899_v1, %s2676_s4  ;;  %v1207_v4 = vmax.f32 %v1081_v53, 0.0 }
 0x286   : > { %v901_v57 = vpop.f32.mrf.mxu0  ;;  %v1083_v58 = vpop.f32.mrf.mxu1 }
 0x287   : > { %v902_v59 = vadd.f32 %v3001_v52, %v901_v57  ;;  %v1084_v60 = vadd.f32 %v3007_v49, %v1083_v58  ;;  %1715 = vrot.lane.b32.xlu1 %v910_v54, %s2676_s4  ;;  %v1210_v61 = vmax.f32 %v1092_v55, 0.0 }
 0x288   : > { %v2302_v63 = vpop.f32.mrf.mxu0  ;;  %v2338_v2 = vpop.f32.mrf.mxu1 }
 0x289   : > { %v1208_v0 = vmax.f32 %v1084_v60, 0.0  ;;  %1711 = vrot.lane.b32.xlu0 %v902_v59, %s2676_s4  ;;  %v923_v9 = vadd.f32 %v2302_v63, %v3001_v52  ;;  %v1240_v10 = vpack.c.bf16 %v1210_v61, %v1209_v5  ;;  %v1105_v18 = vadd.f32 %v2338_v2, %v3007_v49 }
 0x28a   : > { %v914_v6 = vpop.f32.mrf.mxu0  ;;  %v1096_v7 = vpop.f32.mrf.mxu1 }
 0x28b   : > { %v1239_v8 = vpack.c.bf16 %v1208_v0, %v1207_v4  ;;  %v1097_v14 = vadd.f32 %v3007_v49, %v1096_v7  ;;  %v915_v22 = vadd.f32 %v3001_v52, %v914_v6  ;;  %v1213_v27 = vmax.f32 %v1105_v18, 0.0 }
 0x28c   : > { %v2303_v11 = vpop.f32.mrf.mxu0  ;;  %v2339_v13 = vpop.f32.mrf.mxu1 }
 0x28d   : > { %v926_v15 = vadd.f32 %v2303_v11, %v3001_v52  ;;  %v1108_v16 = vadd.f32 %v2339_v13, %v3007_v49  ;;  %2380 = vmatprep.mubr.bf16.mxu0 %v1239_v8  ;;  %1721 = vrot.lane.b32.xlu0 %v923_v9, %s2676_s4  ;;  %v1211_v26 = vmax.f32 %v1097_v14, 0.0 }
 0x28e   : > { %v917_v19 = vpop.f32.mrf.mxu0  ;;  %v1099_v20 = vpop.f32.mrf.mxu1  ;;  %2381 = vmatmul.mubr.bf16.vlgmr.msra.gmra.mxu0 %v1240_v10 }
 0x28f   : > { %v1100_v23 = vadd.f32 %v3007_v49, %v1099_v20  ;;  %1723 = vrot.lane.b32.xlu1 %v926_v15, %s2676_s4  ;;  %v1214_v24 = vmax.f32 %v1108_v16, 0.0  ;;  %v918_v62 = vadd.f32 %v3001_v52, %v917_v19 }
 0x290   : > { %v2306_v17 = vpop.f32.mrf.mxu0  ;;  %v2342_v25 = vpop.f32.mrf.mxu1 }
 0x291   : > { %v1212_v3 = vmax.f32 %v1100_v23, 0.0  ;;  %1717 = vrot.lane.b32.xlu0 %v915_v22, %s2676_s4  ;;  %v939_v31 = vadd.f32 %v2306_v17, %v3001_v52  ;;  %v1242_v32 = vpack.c.bf16 %v1214_v24, %v1213_v27  ;;  %v1121_v37 = vadd.f32 %v2342_v25, %v3007_v49 }
 0x292   : > { %v930_v28 = vpop.f32.mrf.mxu0  ;;  %v1112_v29 = vpop.f32.mrf.mxu1 }
 0x293   : > { %v1241_v30 = vpack.c.bf16 %v1212_v3, %v1211_v26  ;;  %1719 = vrot.lane.b32.xlu1 %v918_v62, %s2676_s4  ;;  %v1113_v35 = vadd.f32 %v3007_v49, %v1112_v29  ;;  %v931_v40 = vadd.f32 %v3001_v52, %v930_v28  ;;  %v1217_v48 = vmax.f32 %v1121_v37, 0.0 }
 0x294   : > { %v2307_v33 = vpop.f32.mrf.mxu0  ;;  %v2343_v34 = vpop.f32.mrf.mxu1 }
 0x295   : > { %v942_v36 = vadd.f32 %v2307_v33, %v3001_v52  ;;  %v1124_v12 = vadd.f32 %v2343_v34, %v3007_v49  ;;  %2384 = vmatprep.mubr.bf16.mxu0 %v1241_v30  ;;  %1729 = vrot.lane.b32.xlu0 %v939_v31, %s2676_s4  ;;  %v1215_v45 = vmax.f32 %v1113_v35, 0.0 }
 0x296   : > { %v933_v21 = vpop.f32.mrf.mxu0  ;;  %v1115_v39 = vpop.f32.mrf.mxu1  ;;  %2385 = vmatmul.mubr.bf16.gmra.mxu0 %v1242_v32 }
 0x297   : > { %v1116_v41 = vadd.f32 %v3007_v49, %v1115_v39  ;;  %1731 = vrot.lane.b32.xlu1 %v942_v36, %s2676_s4  ;;  %v1218_v42 = vmax.f32 %v1124_v12, 0.0  ;;  %v934_v46 = vadd.f32 %v3001_v52, %v933_v21 }
 0x298   : > { %v2310_v43 = vpop.f32.mrf.mxu0  ;;  %v2346_v44 = vpop.f32.mrf.mxu1 }
 0x299   : > { %v1216_v47 = vmax.f32 %v1116_v41, 0.0  ;;  %1725 = vrot.lane.b32.xlu0 %v931_v40, %s2676_s4  ;;  %v955_v51 = vadd.f32 %v2310_v43, %v3001_v52  ;;  %v1244_v53 = vpack.c.bf16 %v1218_v42, %v1217_v48  ;;  %v1137_v59 = vadd.f32 %v2346_v44, %v3007_v49 }
 0x29a   : > { %v946_v38 = vpop.f32.mrf.mxu0  ;;  %v1128_v1 = vpop.f32.mrf.mxu1 }
 0x29b   : > { %v1243_v50 = vpack.c.bf16 %v1216_v47, %v1215_v45  ;;  %1727 = vrot.lane.b32.xlu1 %v934_v46, %s2676_s4  ;;  %v1129_v56 = vadd.f32 %v3007_v49, %v1128_v1  ;;  %v947_v63 = vadd.f32 %v3001_v52, %v946_v38  ;;  %v1221_v9 = vmax.f32 %v1137_v59, 0.0 }
 0x29c   : > { %v2311_v54 = vpop.f32.mrf.mxu0  ;;  %v2347_v55 = vpop.f32.mrf.mxu1 }
 0x29d   : > { %v958_v57 = vadd.f32 %v2311_v54, %v3001_v52  ;;  %v1140_v58 = vadd.f32 %v2347_v55, %v3007_v49  ;;  %2388 = vmatprep.mubr.bf16.mxu0 %v1243_v50  ;;  %1737 = vrot.lane.b32.xlu0 %v955_v51, %s2676_s4  ;;  %v1219_v6 = vmax.f32 %v1129_v56, 0.0 }
 0x29e   : > { %v949_v60 = vpop.f32.mrf.mxu0  ;;  %v1131_v61 = vpop.f32.mrf.mxu1  ;;  %2389 = vmatmul.mubr.bf16.gmra.mxu0 %v1244_v53 }
 0x29f   : > { %v1132_v2 = vadd.f32 %v3007_v49, %v1131_v61  ;;  %1739 = vrot.lane.b32.xlu1 %v958_v57, %s2676_s4  ;;  %v1222_v4 = vmax.f32 %v1140_v58, 0.0  ;;  %v950_v7 = vadd.f32 %v3001_v52, %v949_v60 }
 0x2a0   : > { %v2314_v0 = vpop.f32.mrf.mxu0  ;;  %v2350_v5 = vpop.f32.mrf.mxu1 }
 0x2a1   : > { %v1220_v8 = vmax.f32 %v1132_v2, 0.0  ;;  %1733 = vrot.lane.b32.xlu0 %v947_v63, %s2676_s4  ;;  %v971_v14 = vadd.f32 %v2314_v0, %v3001_v52  ;;  %v1246_v15 = vpack.c.bf16 %v1222_v4, %v1221_v9  ;;  %v1153_v23 = vadd.f32 %v2350_v5, %v3007_v49 }
 0x2a2   : > { %v962_v10 = vpop.f32.mrf.mxu0  ;;  %v1144_v11 = vpop.f32.mrf.mxu1 }
 0x2a3   : > { %v1245_v13 = vpack.c.bf16 %v1220_v8, %v1219_v6  ;;  %1735 = vrot.lane.b32.xlu1 %v950_v7, %s2676_s4  ;;  %v1145_v19 = vadd.f32 %v3007_v49, %v1144_v11  ;;  %v963_v25 = vadd.f32 %v3001_v52, %v962_v10  ;;  %v1225_v31 = vmax.f32 %v1153_v23, 0.0 }
 0x2a4   : > { %v2315_v16 = vpop.f32.mrf.mxu0  ;;  %v2351_v18 = vpop.f32.mrf.mxu1 }
 0x2a5   : > { %v974_v20 = vadd.f32 %v2315_v16, %v3001_v52  ;;  %v1156_v22 = vadd.f32 %v2351_v18, %v3007_v49  ;;  %2392 = vmatprep.mubr.bf16.mxu0 %v1245_v13  ;;  %1745 = vrot.lane.b32.xlu0 %v971_v14, %s2676_s4  ;;  %v1223_v28 = vmax.f32 %v1145_v19, 0.0 }
 0x2a6   : > { %v965_v24 = vpop.f32.mrf.mxu0  ;;  %v1147_v17 = vpop.f32.mrf.mxu1  ;;  %2393 = vmatmul.mubr.bf16.gmra.mxu0 %v1246_v15 }
 0x2a7   : > { %v1148_v26 = vadd.f32 %v3007_v49, %v1147_v17  ;;  %1747 = vrot.lane.b32.xlu1 %v974_v20, %s2676_s4  ;;  %v1226_v62 = vmax.f32 %v1156_v22, 0.0  ;;  %v966_v29 = vadd.f32 %v3001_v52, %v965_v24 }
 0x2a8   : > { %v2318_v3 = vpop.f32.mrf.mxu0  ;;  %v2354_v27 = vpop.f32.mrf.mxu1 }
 0x2a9   : > { %v1224_v30 = vmax.f32 %v1148_v26, 0.0  ;;  %1741 = vrot.lane.b32.xlu0 %v963_v25, %s2676_s4  ;;  %v987_v35 = vadd.f32 %v2318_v3, %v3001_v52  ;;  %v1248_v36 = vpack.c.bf16 %v1226_v62, %v1225_v31  ;;  %v1169_v41 = vadd.f32 %v2354_v27, %v3007_v49 }
 0x2aa   : > { %v978_v32 = vpop.f32.mrf.mxu0  ;;  %v1160_v33 = vpop.f32.mrf.mxu1 }
 0x2ab   : > { %v1247_v34 = vpack.c.bf16 %v1224_v30, %v1223_v28  ;;  %1743 = vrot.lane.b32.xlu1 %v966_v29, %s2676_s4  ;;  %v1161_v21 = vadd.f32 %v3007_v49, %v1160_v33  ;;  %v979_v44 = vadd.f32 %v3001_v52, %v978_v32  ;;  %v1229_v51 = vmax.f32 %v1169_v41, 0.0 }
 0x2ac   : > { %v2319_v12 = vpop.f32.mrf.mxu0  ;;  %v2355_v37 = vpop.f32.mrf.mxu1 }
 0x2ad   : > { %v990_v39 = vadd.f32 %v2319_v12, %v3001_v52  ;;  %v1172_v40 = vadd.f32 %v2355_v37, %v3007_v49  ;;  %2396 = vmatprep.mubr.bf16.mxu0 %v1247_v34  ;;  %1753 = vrot.lane.b32.xlu0 %v987_v35, %s2676_s4  ;;  %v1227_v38 = vmax.f32 %v1161_v21, 0.0 }
 0x2ae   : > { %v981_v42 = vpop.f32.mrf.mxu0  ;;  %v1163_v43 = vpop.f32.mrf.mxu1  ;;  %2397 = vmatmul.mubr.bf16.gmra.mxu0 %v1248_v36 }
 0x2af   : > { %v1164_v45 = vadd.f32 %v3007_v49, %v1163_v43  ;;  %1755 = vrot.lane.b32.xlu1 %v990_v39, %s2676_s4  ;;  %v1230_v46 = vmax.f32 %v1172_v40, 0.0  ;;  %v982_v1 = vadd.f32 %v3001_v52, %v981_v42 }
 0x2b0   : > { %v2322_v47 = vpop.f32.mrf.mxu0  ;;  %v2358_v48 = vpop.f32.mrf.mxu1 }
 0x2b1   : > { %v1228_v50 = vmax.f32 %v1164_v45, 0.0  ;;  %1749 = vrot.lane.b32.xlu0 %v979_v44, %s2676_s4  ;;  %v1003_v56 = vadd.f32 %v2322_v47, %v3001_v52  ;;  %v1250_v57 = vpack.c.bf16 %v1230_v46, %v1229_v51  ;;  %v1185_v2 = vadd.f32 %v2358_v48, %v3007_v49 }
 0x2b2   : > { %v994_v53 = vpop.f32.mrf.mxu0  ;;  %v1176_v54 = vpop.f32.mrf.mxu1 }
 0x2b3   : > { %v1249_v55 = vpack.c.bf16 %v1228_v50, %v1227_v38  ;;  %1751 = vrot.lane.b32.xlu1 %v982_v1, %s2676_s4  ;;  %v1177_v60 = vadd.f32 %v3007_v49, %v1176_v54  ;;  %v995_v5 = vadd.f32 %v3001_v52, %v994_v53  ;;  %v1233_v14 = vmax.f32 %v1185_v2, 0.0 }
 0x2b4   : > { %v2323_v58 = vpop.f32.mrf.mxu0  ;;  %v2359_v59 = vpop.f32.mrf.mxu1 }
 0x2b5   : > { %v1006_v61 = vadd.f32 %v2323_v58, %v3001_v52  ;;  %v1188_v63 = vadd.f32 %v2359_v59, %v3007_v49  ;;  %2400 = vmatprep.mubr.bf16.mxu0 %v1249_v55  ;;  %1761 = vrot.lane.b32.xlu0 %v1003_v56, %s2676_s4  ;;  %v1231_v10 = vmax.f32 %v1177_v60, 0.0 }
 0x2b6   : > { %v997_v4 = vpop.f32.mrf.mxu0  ;;  %v1179_v0 = vpop.f32.mrf.mxu1  ;;  %2401 = vmatmul.mubr.bf16.gmra.mxu0 %v1250_v57 }
 0x2b7   : > { %v1180_v6 = vadd.f32 %v3007_v49, %v1179_v0  ;;  %1763 = vrot.lane.b32.xlu1 %v1006_v61, %s2676_s4  ;;  %v1234_v7 = vmax.f32 %v1188_v63, 0.0  ;;  %v998_v11 = vadd.f32 %v3001_v52, %v997_v4 }
 0x2b8   : > { %v2326_v8 = vpop.f32.mrf.mxu0  ;;  %v2362_v9 = vpop.f32.mrf.mxu1 }
 0x2b9   : > { %v1232_v13 = vmax.f32 %v1180_v6, 0.0  ;;  %1757 = vrot.lane.b32.xlu0 %v995_v5, %s2676_s4  ;;  %v1252_v20 = vpack.c.bf16 %v1234_v7, %v1233_v14  ;;  %v1201_v25 = vadd.f32 %v2362_v9, %v3007_v49  ;;  %v1019_v3 = vadd.f32 %v2326_v8, %v3001_v52 }
 0x2ba   : > { %v1010_v15 = vpop.f32.mrf.mxu0  ;;  %v1192_v16 = vpop.f32.mrf.mxu1 }
 0x2bb   : > { %v1251_v18 = vpack.c.bf16 %v1232_v13, %v1231_v10  ;;  %v1011_v19 = vadd.f32 %v3001_v52, %v1010_v15  ;;  %1759 = vrot.lane.b32.xlu1 %v998_v11, %s2676_s4  ;;  %v1193_v24 = vadd.f32 %v3007_v49, %v1192_v16  ;;  %v1237_v32 = vmax.f32 %v1201_v25, 0.0 }
 0x2bc   : > { %v2327_v22 = vpop.f32.mrf.mxu0  ;;  %v2363_v23 = vpop.f32.mrf.mxu1 }
 0x2bd   : > { %v1204_v17 = vadd.f32 %v2363_v23, %v3007_v49  ;;  %2404 = vmatprep.mubr.bf16.mxu0 %v1251_v18  ;;  %1765 = vrot.lane.b32.xlu0 %v1011_v19, %s2676_s4  ;;  %v1235_v30 = vmax.f32 %v1193_v24, 0.0  ;;  %v1022_v33 = vadd.f32 %v2327_v22, %v3001_v52 }
 0x2be   : > { %v1013_v26 = vpop.f32.mrf.mxu0  ;;  %v1195_v62 = vpop.f32.mrf.mxu1  ;;  %2405 = vmatmul.mubr.bf16.gmra.mxu0 %v1252_v20 }
 0x2bf   : > { %v1014_v27 = vadd.f32 %v3001_v52, %v1013_v26  ;;  %v1196_v28 = vadd.f32 %v3007_v49, %v1195_v62  ;;  %v1238_v29 = vmax.f32 %v1204_v17, 0.0  ;;  %v3107_v49 = vld [vmem:[%s3355_s2 + $0x4] ss:$0 sm:$0xff] }
 0x2c1   : > { %v1236_v31 = vmax.f32 %v1196_v28, 0.0  ;;  %1767 = vrot.lane.b32.xlu1 %v1014_v27, %s2676_s4  ;;  %1769 = vrot.lane.b32.xlu0 %v1019_v3, %s2676_s4  ;;  %v1254_v35 = vpack.c.bf16 %v1238_v29, %v1237_v32 }
 0x2c3   : > { %v1253_v34 = vpack.c.bf16 %v1236_v31, %v1235_v30 }
 0x2c5   : > { %2408 = vmatprep.mubr.bf16.mxu0 %v1253_v34  ;;  %1771 = vrot.lane.b32.xlu1 %v1022_v33, %s2676_s4 }
 0x2c6   : > { %2409 = vmatmul.mubr.bf16.gmra.mxu0 %v1254_v35 }
 0x2f5   : > { %v3117_v48 = vpop.permute.xlu1 %1713 }
 0x2f7   : > { %v3109_v12 = vpop.permute.xlu0 %1709 }
 0x2f9   : > { %v3124_v59 = vpop.permute.xlu1 %1715 }
 0x2fb   : > { %v3114_v44 = vpop.permute.xlu0 %1711 }
 0x2ff   : > { %v3121_v55 = vpop.permute.xlu0 %1721 }
 0x301   : > { %v3128_v6 = vpop.permute.xlu1 %1723 }
 0x303   : > { %v3130_v7 = vpop.permute.xlu0 %1717 }
 0x305   : > { %v3135_v25 = vpop.permute.xlu1 %1719 }
 0x307   : > { %v3137_v26 = vpop.permute.xlu0 %1729 }
 0x34e   : > { %v2382_v36 = vpop.f32.mrf.mxu0 }
 0x34f   : > { %v1367_v37 = vadd.f32 %v2382_v36, %v3107_v49 }
 0x350   : > { %v1358_v21 = vpop.f32.mrf.mxu0 }
 0x351   : > { %v2064_v39 = vmul.f32 -1.442695, %v1367_v37  ;;  %v1359_v52 = vadd.f32 %v3107_v49, %v1358_v21 }
 0x352   : > { %v2383_v40 = vpop.f32.mrf.mxu0 }
 0x353   : > { %2486 = vpow2.f32 %v2064_v39  ;;  %v2062_v41 = vmul.f32 -1.442695, %v1359_v52  ;;  %v1370_v42 = vadd.f32 %v2383_v40, %v3107_v49  ;;  %v3143_v52 = vpop.permute.xlu1 %1731  ;;  %v3145_v40 = vpop.permute.xlu0 %1725 }
 0x354   : > { %v1361_v43 = vpop.f32.mrf.mxu0 }
 0x355   : > { %2488 = vpow2.f32 %v2062_v41  ;;  %v2065_v45 = vmul.f32 -1.442695, %v1370_v42  ;;  %v1362_v46 = vadd.f32 %v3107_v49, %v1361_v43 }
 0x356   : > { %v2386_v47 = vpop.f32.mrf.mxu0 }
 0x357   : > { %2490 = vpow2.f32 %v2065_v45  ;;  %v2063_v38 = vmul.f32 -1.442695, %v1362_v46  ;;  %v1383_v1 = vadd.f32 %v2386_v47, %v3107_v49 }
 0x358   : > { %v1374_v50 = vpop.f32.mrf.mxu0 }
 0x359   : > { %2492 = vpow2.f32 %v2063_v38  ;;  %v2068_v51 = vmul.f32 -1.442695, %v1383_v1  ;;  %v1375_v53 = vadd.f32 %v3107_v49, %v1374_v50 }
 0x35a   : > { %v2387_v54 = vpop.f32.mrf.mxu0 }
 0x35b   : > { %2494 = vpow2.f32 %v2068_v51  ;;  %v2066_v56 = vmul.f32 -1.442695, %v1375_v53  ;;  %v1386_v57 = vadd.f32 %v2387_v54, %v3107_v49 }
 0x35c   : > { %v1377_v58 = vpop.f32.mrf.mxu0 }
 0x35d   : > { %2496 = vpow2.f32 %v2066_v56  ;;  %v2069_v60 = vmul.f32 -1.442695, %v1386_v57  ;;  %v1378_v61 = vadd.f32 %v3107_v49, %v1377_v58 }
 0x35e   : > { %v2390_v63 = vpop.f32.mrf.mxu0 }
 0x35f   : > { %2498 = vpow2.f32 %v2069_v60  ;;  %v2067_v2 = vmul.f32 -1.442695, %v1378_v61  ;;  %v1399_v4 = vadd.f32 %v2390_v63, %v3107_v49 }
 0x360   : > { %v2487_v0 = vpop.eup %2486  ;;  %v1390_v5 = vpop.f32.mrf.mxu0 }
 0x361   : > { %v1583_v8 = vadd.f32 1.0, %v2487_v0  ;;  %2500 = vpow2.f32 %v2067_v2  ;;  %v2072_v9 = vmul.f32 -1.442695, %v1399_v4  ;;  %v1391_v10 = vadd.f32 %v3107_v49, %v1390_v5  ;;  %v3155_v4 = vpop.permute.xlu1 %1727  ;;  %v3157_v0 = vpop.permute.xlu0 %1737 }
 0x362   : > { %v2489_v11 = vpop.eup %2488  ;;  %v2391_v13 = vpop.f32.mrf.mxu0 }
 0x363   : > { %2502 = vrcp.f32 %v1583_v8  ;;  %v1581_v14 = vadd.f32 1.0, %v2489_v11  ;;  %v2070_v15 = vmul.f32 -1.442695, %v1391_v10  ;;  %v1402_v16 = vadd.f32 %v2391_v13, %v3107_v49 }
 0x364   : > { %v2491_v18 = vpop.eup %2490  ;;  %2504 = vpow2.f32 %v2072_v9  ;;  %v1393_v19 = vpop.f32.mrf.mxu0 }
 0x365   : > { %2506 = vrcp.f32 %v1581_v14  ;;  %v1584_v20 = vadd.f32 1.0, %v2491_v18  ;;  %v2073_v22 = vmul.f32 -1.442695, %v1402_v16  ;;  %v1394_v23 = vadd.f32 %v3107_v49, %v1393_v19 }
 0x366   : > { %v2493_v24 = vpop.eup %2492  ;;  %2508 = vpow2.f32 %v2070_v15  ;;  %v2394_v17 = vpop.f32.mrf.mxu0 }
 0x367   : > { %2510 = vrcp.f32 %v1584_v20  ;;  %v1582_v62 = vadd.f32 1.0, %v2493_v24  ;;  %v2071_v3 = vmul.f32 -1.442695, %v1394_v23  ;;  %v1415_v27 = vadd.f32 %v2394_v17, %v3107_v49 }
 0x368   : > { %v2495_v28 = vpop.eup %2494  ;;  %2512 = vpow2.f32 %v2073_v22  ;;  %v1406_v29 = vpop.f32.mrf.mxu0 }
 0x369   : > { %2514 = vrcp.f32 %v1582_v62  ;;  %v1587_v30 = vadd.f32 1.0, %v2495_v28  ;;  %v2076_v31 = vmul.f32 -1.442695, %v1415_v27  ;;  %v1407_v32 = vadd.f32 %v3107_v49, %v1406_v29 }
 0x36a   : > { %v2497_v33 = vpop.eup %2496  ;;  %2516 = vpow2.f32 %v2071_v3  ;;  %v2395_v34 = vpop.f32.mrf.mxu0 }
 0x36b   : > { %2518 = vrcp.f32 %v1587_v30  ;;  %v1585_v35 = vadd.f32 1.0, %v2497_v33  ;;  %v2074_v36 = vmul.f32 -1.442695, %v1407_v32  ;;  %v1418_v37 = vadd.f32 %v2395_v34, %v3107_v49  ;;  %v3176_v30 = vpop.permute.xlu1 %1739 }
 0x36c   : > { %v2499_v21 = vpop.eup %2498  ;;  %2520 = vpow2.f32 %v2076_v31  ;;  %v1409_v39 = vpop.f32.mrf.mxu0 }
 0x36d   : > { %2522 = vrcp.f32 %v1585_v35  ;;  %v1588_v41 = vadd.f32 1.0, %v2499_v21  ;;  %v2077_v42 = vmul.f32 -1.442695, %v1418_v37  ;;  %v1410_v43 = vadd.f32 %v3107_v49, %v1409_v39  ;;  %v3178_v31 = vpop.permute.xlu0 %1733 }
 0x36e   : > { %v2501_v45 = vpop.eup %2500  ;;  %2524 = vpow2.f32 %v2074_v36  ;;  %v2398_v46 = vpop.f32.mrf.mxu0 }
 0x36f   : > { %2526 = vrcp.f32 %v1588_v41  ;;  %v1586_v47 = vadd.f32 1.0, %v2501_v45  ;;  %v2075_v38 = vmul.f32 -1.442695, %v1410_v43  ;;  %v1431_v1 = vadd.f32 %v2398_v46, %v3107_v49 }
 0x370   : > { %v2503_v50 = vpop.eup %2502  ;;  %2528 = vpow2.f32 %v2077_v42  ;;  %v1422_v51 = vpop.f32.mrf.mxu0 }
 0x371   : > { %v2505_v53 = vpop.eup %2504  ;;  %v1807_v54 = vsel %vm258_vm0, %v2503_v50, %v3117_v48  ;;  %2530 = vrcp.f32 %v1586_v47  ;;  %v2080_v56 = vmul.f32 -1.442695, %v1431_v1  ;;  %v1423_v57 = vadd.f32 %v3107_v49, %v1422_v51 }
 0x372   : > { %v2507_v58 = vpop.eup %2506  ;;  %v1840_v60 = vsel %vm1837_vm2, %v1807_v54, 0.0  ;;  %v1591_v61 = vadd.f32 1.0, %v2505_v53  ;;  %2532 = vpow2.f32 %v2075_v38  ;;  %v2399_v63 = vpop.f32.mrf.mxu0 }
 0x373   : > { %v2509_v2 = vpop.eup %2508  ;;  %1872 = vst [vmem:[%s3159_s9 + $0x10] sm:$0xff] %v1840_v60  ;;  %v1805_v48 = vsel %vm258_vm0, %v2507_v58, %v3109_v12  ;;  %2534 = vpow2.f32 %v2080_v56  ;;  %v2078_v5 = vmul.f32 -1.442695, %v1423_v57  ;;  %v1434_v8 = vadd.f32 %v2399_v63, %v3107_v49  ;;  %v3195_v57 = vpop.permute.xlu1 %1735 }
 0x374   : > { %v2511_v9 = vpop.eup %2510  ;;  %v1838_v10 = vsel %vm1837_vm2, %v1805_v48, 0.0  ;;  %2536 = vrcp.f32 %v1591_v61  ;;  %v1589_v11 = vadd.f32 1.0, %v2509_v2  ;;  %v1425_v13 = vpop.f32.mrf.mxu0 }
 0x375   : > { %v2513_v14 = vpop.eup %2512  ;;  %1870 = vst [vmem:[%s3159_s9] sm:$0xff] %v1838_v10  ;;  %v1808_v15 = vsel %vm258_vm0, %v2511_v9, %v3124_v59  ;;  %2538 = vpow2.f32 %v2078_v5  ;;  %v2081_v16 = vmul.f32 -1.442695, %v1434_v8  ;;  %v1426_v12 = vadd.f32 %v3107_v49, %v1425_v13  ;;  %v3197_v58 = vpop.permute.xlu0 %1745 }
 0x376   : > { %v2515_v18 = vpop.eup %2514  ;;  %v1841_v19 = vsel %vm1837_vm2, %v1808_v15, 0.0  ;;  %2540 = vrcp.f32 %v1589_v11  ;;  %v1592_v20 = vadd.f32 1.0, %v2513_v14  ;;  %v2402_v22 = vpop.f32.mrf.mxu0 }
 0x377   : > { %v2517_v23 = vpop.eup %2516  ;;  %1873 = vst [vmem:[%s3159_s9 + $0x18] sm:$0xff] %v1841_v19  ;;  %v1806_v24 = vsel %vm258_vm0, %v2515_v18, %v3114_v44  ;;  %2542 = vpow2.f32 %v2081_v16  ;;  %v2079_v17 = vmul.f32 -1.442695, %v1426_v12  ;;  %v1447_v59 = vadd.f32 %v2402_v22, %v3107_v49 }
 0x378   : > { %v2519_v62 = vpop.eup %2518  ;;  %v1839_v3 = vsel %vm1837_vm2, %v1806_v24, 0.0  ;;  %2544 = vrcp.f32 %v1592_v20  ;;  %v1590_v27 = vadd.f32 1.0, %v2517_v23  ;;  %v1438_v28 = vpop.f32.mrf.mxu0 }
 0x379   : > { %v2521_v29 = vpop.eup %2520  ;;  %1871 = vst [vmem:[%s3159_s9 + $0x8] sm:$0xff] %v1839_v3  ;;  %v1811_v44 = vsel %vm258_vm0, %v2519_v62, %v3121_v55  ;;  %2546 = vpow2.f32 %v2079_v17  ;;  %v2084_v32 = vmul.f32 -1.442695, %v1447_v59  ;;  %v1439_v33 = vadd.f32 %v3107_v49, %v1438_v28  ;;  %v3215_v17 = vpop.permute.xlu0 %1741 }
 0x37a   : > { %v2523_v34 = vpop.eup %2522  ;;  %v1844_v35 = vsel %vm1837_vm2, %v1811_v44, 0.0  ;;  %2548 = vrcp.f32 %v1590_v27  ;;  %v1595_v36 = vadd.f32 1.0, %v2521_v29  ;;  %v2403_v37 = vpop.f32.mrf.mxu0 }
 0x37b   : > { %v2525_v21 = vpop.eup %2524  ;;  %1876 = vst [vmem:[%s3159_s9 + $0x30] sm:$0xff] %v1844_v35  ;;  %v1809_v39 = vsel %vm258_vm0, %v2523_v34, %v3130_v7  ;;  %2550 = vpow2.f32 %v2084_v32  ;;  %v2082_v41 = vmul.f32 -1.442695, %v1439_v33  ;;  %v1450_v55 = vadd.f32 %v2403_v37, %v3107_v49 }
 0x37c   : > { %v2527_v42 = vpop.eup %2526  ;;  %v1842_v43 = vsel %vm1837_vm2, %v1809_v39, 0.0  ;;  %2552 = vrcp.f32 %v1595_v36  ;;  %v1593_v45 = vadd.f32 1.0, %v2525_v21  ;;  %v1441_v46 = vpop.f32.mrf.mxu0 }
 0x37d   : > { %v2529_v47 = vpop.eup %2528  ;;  %1874 = vst [vmem:[%s3159_s9 + $0x20] sm:$0xff] %v1842_v43  ;;  %v1812_v38 = vsel %vm258_vm0, %v2527_v42, %v3128_v6  ;;  %2554 = vpow2.f32 %v2082_v41  ;;  %v2085_v1 = vmul.f32 -1.442695, %v1450_v55  ;;  %v1442_v7 = vadd.f32 %v3107_v49, %v1441_v46 }
 0x37e   : > { %v2531_v50 = vpop.eup %2530  ;;  %v1845_v51 = vsel %vm1837_vm2, %v1812_v38, 0.0  ;;  %2556 = vrcp.f32 %v1593_v45  ;;  %v1596_v53 = vadd.f32 1.0, %v2529_v47  ;;  %v2406_v54 = vpop.f32.mrf.mxu0 }
 0x37f   : > { %v2533_v56 = vpop.eup %2532  ;;  %1877 = vst [vmem:[%s3159_s9 + $0x38] sm:$0xff] %v1845_v51  ;;  %v1810_v6 = vsel %vm258_vm0, %v2531_v50, %v3135_v25  ;;  %2558 = vpow2.f32 %v2085_v1  ;;  %v2083_v60 = vmul.f32 -1.442695, %v1442_v7  ;;  %v1463_v61 = vadd.f32 %v2406_v54, %v3107_v49  ;;  %v3232_v38 = vpop.permute.xlu0 %1753 }
 0x380   : > { %v2535_v63 = vpop.eup %2534  ;;  %v1843_v2 = vsel %vm1837_vm2, %v1810_v6, 0.0  ;;  %2560 = vrcp.f32 %v1596_v53  ;;  %v1594_v48 = vadd.f32 1.0, %v2533_v56  ;;  %v1454_v5 = vpop.f32.mrf.mxu0 }
 0x381   : > { %v2537_v8 = vpop.eup %2536  ;;  %1875 = vst [vmem:[%s3159_s9 + $0x28] sm:$0xff] %v1843_v2  ;;  %v1599_v9 = vadd.f32 1.0, %v2535_v63  ;;  %2562 = vpow2.f32 %v2083_v60  ;;  %v2088_v10 = vmul.f32 -1.442695, %v1463_v61  ;;  %v1455_v11 = vadd.f32 %v3107_v49, %v1454_v5 }
 0x382   : > { %v2539_v13 = vpop.eup %2538  ;;  %v1815_v25 = vsel %vm258_vm0, %v2537_v8, %v3137_v26  ;;  %2564 = vrcp.f32 %v1594_v48  ;;  %v2407_v14 = vpop.f32.mrf.mxu0 }
 0x383   : > { %v2541_v15 = vpop.eup %2540  ;;  %v1848_v16 = vsel %vm1837_vm2, %v1815_v25, 0.0  ;;  %2566 = vrcp.f32 %v1599_v9  ;;  %v1597_v12 = vadd.f32 1.0, %v2539_v13  ;;  %v2086_v18 = vmul.f32 -1.442695, %v1455_v11  ;;  %v3213_v26 = vpop.permute.xlu1 %1747 }
 0x384   : > { %v2543_v19 = vpop.eup %2542  ;;  %1880 = vst [vmem:[%s3159_s9 + $0x50] sm:$0xff] %v1848_v16  ;;  %v1813_v20 = vsel %vm258_vm0, %v2541_v15, %v3145_v40  ;;  %2568 = vpow2.f32 %v2088_v10  ;;  %v1466_v22 = vadd.f32 %v2407_v14, %v3107_v49  ;;  %v1457_v23 = vpop.f32.mrf.mxu0 }
 0x385   : > { %v2545_v24 = vpop.eup %2544  ;;  %v1846_v59 = vsel %vm1837_vm2, %v1813_v20, 0.0  ;;  %2570 = vrcp.f32 %v1597_v12  ;;  %v1600_v62 = vadd.f32 1.0, %v2543_v19  ;;  %v1458_v3 = vadd.f32 %v3107_v49, %v1457_v23  ;;  %v1750_v25 = vpop.permute.xlu0 %1749 }
 0x386   : > { %v2547_v27 = vpop.eup %2546  ;;  %1878 = vst [vmem:[%s3159_s9 + $0x40] sm:$0xff] %v1846_v59  ;;  %v1816_v40 = vsel %vm258_vm0, %v2545_v24, %v3143_v52  ;;  %2572 = vpow2.f32 %v2086_v18  ;;  %v2089_v28 = vmul.f32 -1.442695, %v1466_v22  ;;  %v2410_v29 = vpop.f32.mrf.mxu0 }
 0x387   : > { %v2549_v44 = vpop.eup %2548  ;;  %v1849_v32 = vsel %vm1837_vm2, %v1816_v40, 0.0  ;;  %2574 = vrcp.f32 %v1600_v62  ;;  %v1598_v33 = vadd.f32 1.0, %v2547_v27  ;;  %v2087_v34 = vmul.f32 -1.442695, %v1458_v3  ;;  %v1744_v47 = vpop.permute.xlu1 %1743 }
 0x388   : > { %v2551_v35 = vpop.eup %2550  ;;  %1881 = vst [vmem:[%s3159_s9 + $0x58] sm:$0xff] %v1849_v32  ;;  %v1814_v36 = vsel %vm258_vm0, %v2549_v44, %v3155_v4  ;;  %2576 = vpow2.f32 %v2089_v28  ;;  %v1479_v37 = vadd.f32 %v2410_v29, %v3107_v49  ;;  %v1470_v21 = vpop.f32.mrf.mxu0 }
 0x389   : > { %v2553_v52 = vpop.eup %2552  ;;  %v1847_v39 = vsel %vm1837_vm2, %v1814_v36, 0.0  ;;  %2578 = vrcp.f32 %v1598_v33  ;;  %v1603_v41 = vadd.f32 1.0, %v2551_v35  ;;  %v1471_v55 = vadd.f32 %v3107_v49, %v1470_v21 }
 0x38a   : > { %v2555_v42 = vpop.eup %2554  ;;  %1879 = vst [vmem:[%s3159_s9 + $0x48] sm:$0xff] %v1847_v39  ;;  %v1819_v43 = vsel %vm258_vm0, %v2553_v52, %v3157_v0  ;;  %2580 = vpow2.f32 %v2087_v34  ;;  %v2092_v45 = vmul.f32 -1.442695, %v1479_v37  ;;  %v2411_v4 = vpop.f32.mrf.mxu0 }
 0x38b   : > { %v2557_v46 = vpop.eup %2556  ;;  %v1852_v1 = vsel %vm1837_vm2, %v1819_v43, 0.0  ;;  %2582 = vrcp.f32 %v1603_v41  ;;  %v1601_v7 = vadd.f32 1.0, %v2555_v42  ;;  %v2090_v50 = vmul.f32 -1.442695, %v1471_v55  ;;  %v1756_v13 = vpop.permute.xlu1 %1755 }
 0x38c   : > { %v2559_v51 = vpop.eup %2558  ;;  %1884 = vst [vmem:[%s3159_s9 + $0x70] sm:$0xff] %v1852_v1  ;;  %v1817_v53 = vsel %vm258_vm0, %v2557_v46, %v3178_v31  ;;  %2584 = vpow2.f32 %v2092_v45  ;;  %v1482_v0 = vadd.f32 %v2411_v4, %v3107_v49  ;;  %v1473_v54 = vpop.f32.mrf.mxu0 }
 0x38d   : > { %v2561_v56 = vpop.eup %2560  ;;  %v1850_v6 = vsel %vm1837_vm2, %v1817_v53, 0.0  ;;  %2586 = vrcp.f32 %v1601_v7  ;;  %v1604_v60 = vadd.f32 1.0, %v2559_v51  ;;  %v1474_v61 = vadd.f32 %v3107_v49, %v1473_v54 }
 0x38e   : > { %v2563_v63 = vpop.eup %2562  ;;  %1882 = vst [vmem:[%s3159_s9 + $0x60] sm:$0xff] %v1850_v6  ;;  %v1820_v2 = vsel %vm258_vm0, %v2561_v56, %v3176_v30  ;;  %2588 = vpow2.f32 %v2090_v50  ;;  %v2093_v48 = vmul.f32 -1.442695, %v1482_v0 }
 0x38f   : > { %v2565_v31 = vpop.eup %2564  ;;  %v1853_v5 = vsel %vm1837_vm2, %v1820_v2, 0.0  ;;  %2590 = vrcp.f32 %v1604_v60  ;;  %v1602_v8 = vadd.f32 1.0, %v2563_v63  ;;  %v2091_v9 = vmul.f32 -1.442695, %v1474_v61  ;;  %v1752_v27 = vpop.permute.xlu1 %1751 }
 0x390   : > { %v2567_v10 = vpop.eup %2566  ;;  %1885 = vst [vmem:[%s3159_s9 + $0x78] sm:$0xff] %v1853_v5  ;;  %v1818_v49 = vsel %vm258_vm0, %v2565_v31, %v3195_v57  ;;  %2592 = vpow2.f32 %v2093_v48 }
 0x391   : > { %v2569_v11 = vpop.eup %2568  ;;  %v1851_v30 = vsel %vm1837_vm2, %v1818_v49, 0.0  ;;  %v1823_v14 = vsel %vm258_vm0, %v2567_v10, %v3197_v58  ;;  %2594 = vrcp.f32 %v1602_v8 }
 0x392   : > { %v2571_v15 = vpop.eup %2570  ;;  %1883 = vst [vmem:[%s3159_s9 + $0x68] sm:$0xff] %v1851_v30  ;;  %v1856_v16 = vsel %vm1837_vm2, %v1823_v14, 0.0  ;;  %v1607_v12 = vadd.f32 1.0, %v2569_v11  ;;  %2596 = vpow2.f32 %v2091_v9 }
 0x393   : > { %v2573_v18 = vpop.eup %2572  ;;  %1888 = vst [vmem:[%s3159_s9 + $0x90] sm:$0xff] %v1856_v16  ;;  %v1821_v57 = vsel %vm258_vm0, %v2571_v15, %v3215_v17  ;;  %v1762_v17 = vpop.permute.xlu0 %1761 }
 0x394   : > { %v2575_v19 = vpop.eup %2574  ;;  %v1854_v20 = vsel %vm1837_vm2, %v1821_v57, 0.0  ;;  %2598 = vrcp.f32 %v1607_v12  ;;  %v1605_v22 = vadd.f32 1.0, %v2573_v18  ;;  %v1764_v55 = vpop.permute.xlu1 %1763 }
 0x395   : > { %v2577_v23 = vpop.eup %2576  ;;  %1886 = vst [vmem:[%s3159_s9 + $0x80] sm:$0xff] %v1854_v20  ;;  %v1824_v58 = vsel %vm258_vm0, %v2575_v19, %v3213_v26 }
 0x396   : > { %v2579_v24 = vpop.eup %2578  ;;  %v1857_v59 = vsel %vm1837_vm2, %v1824_v58, 0.0  ;;  %2600 = vrcp.f32 %v1605_v22  ;;  %v1608_v62 = vadd.f32 1.0, %v2577_v23 }
 0x397   : > { %v2581_v3 = vpop.eup %2580  ;;  %1889 = vst [vmem:[%s3159_s9 + $0x98] sm:$0xff] %v1857_v59  ;;  %v1822_v40 = vsel %vm258_vm0, %v2579_v24, %v1744_v47  ;;  %v1758_v42 = vpop.permute.xlu0 %1757 }
 0x398   : > { %v2583_v28 = vpop.eup %2582  ;;  %v1855_v29 = vsel %vm1837_vm2, %v1822_v40, 0.0  ;;  %2602 = vrcp.f32 %v1608_v62  ;;  %v1606_v44 = vadd.f32 1.0, %v2581_v3  ;;  %v1760_v0 = vpop.permute.xlu1 %1759 }
 0x399   : > { %v2585_v32 = vpop.eup %2584  ;;  %1887 = vst [vmem:[%s3159_s9 + $0x88] sm:$0xff] %v1855_v29  ;;  %v1827_v26 = vsel %vm258_vm0, %v2583_v28, %v3232_v38 }
 0x39a   : > { %v2587_v33 = vpop.eup %2586  ;;  %v1860_v34 = vsel %vm1837_vm2, %v1827_v26, 0.0  ;;  %2604 = vrcp.f32 %v1606_v44  ;;  %v1611_v35 = vadd.f32 1.0, %v2585_v32 }
 0x39b   : > { %v2589_v36 = vpop.eup %2588  ;;  %1892 = vst [vmem:[%s3159_s9 + $0xb0] sm:$0xff] %v1860_v34  ;;  %v1825_v37 = vsel %vm258_vm0, %v2587_v33, %v1750_v25  ;;  %v1766_v54 = vpop.permute.xlu0 %1765 }
 0x39c   : > { %v2591_v21 = vpop.eup %2590  ;;  %v1858_v52 = vsel %vm1837_vm2, %v1825_v37, 0.0  ;;  %2606 = vrcp.f32 %v1611_v35  ;;  %v1609_v39 = vadd.f32 1.0, %v2589_v36  ;;  %v1768_v48 = vpop.permute.xlu1 %1767 }
 0x39d   : > { %v2593_v41 = vpop.eup %2592  ;;  %1890 = vst [vmem:[%s3159_s9 + $0xa0] sm:$0xff] %v1858_v52  ;;  %v1828_v43 = vsel %vm258_vm0, %v2591_v21, %v1756_v13 }
 0x39e   : > { %v2595_v45 = vpop.eup %2594  ;;  %v1861_v4 = vsel %vm1837_vm2, %v1828_v43, 0.0  ;;  %2608 = vrcp.f32 %v1609_v39  ;;  %v1612_v46 = vadd.f32 1.0, %v2593_v41 }
 0x39f   : > { %v2597_v47 = vpop.eup %2596  ;;  %1893 = vst [vmem:[%s3159_s9 + $0xb8] sm:$0xff] %v1861_v4  ;;  %v1826_v38 = vsel %vm258_vm0, %v2595_v45, %v1752_v27  ;;  %v1770_v9 = vpop.permute.xlu0 %1769 }
 0x3a0   : > { %v1859_v1 = vsel %vm1837_vm2, %v1826_v38, 0.0  ;;  %2610 = vrcp.f32 %v1612_v46  ;;  %v1610_v7 = vadd.f32 1.0, %v2597_v47  ;;  %v1772_v14 = vpop.permute.xlu1 %1771 }
 0x3a1   : > { %v2599_v50 = vpop.eup %2598  ;;  %1891 = vst [vmem:[%s3159_s9 + $0xa8] sm:$0xff] %v1859_v1 }
 0x3a2   : > { %v1831_v51 = vsel %vm258_vm0, %v2599_v50, %v1762_v17  ;;  %2612 = vrcp.f32 %v1610_v7 }
 0x3a3   : > { %v2601_v53 = vpop.eup %2600  ;;  %v1864_v56 = vsel %vm1837_vm2, %v1831_v51, 0.0 }
 0x3a4   : > { %1896 = vst [vmem:[%s3159_s9 + $0xd0] sm:$0xff] %v1864_v56  ;;  %v1829_v6 = vsel %vm258_vm0, %v2601_v53, %v1758_v42 }
 0x3a5   : > { %v2603_v60 = vpop.eup %2602  ;;  %v1862_v61 = vsel %vm1837_vm2, %v1829_v6, 0.0 }
 0x3a6   : > { %1894 = vst [vmem:[%s3159_s9 + $0xc0] sm:$0xff] %v1862_v61  ;;  %v1832_v63 = vsel %vm258_vm0, %v2603_v60, %v1764_v55 }
 0x3a7   : > { %v2605_v2 = vpop.eup %2604  ;;  %v1865_v31 = vsel %vm1837_vm2, %v1832_v63, 0.0 }
 0x3a8   : > { %1897 = vst [vmem:[%s3159_s9 + $0xd8] sm:$0xff] %v1865_v31  ;;  %v1830_v5 = vsel %vm258_vm0, %v2605_v2, %v1760_v0 }
 0x3a9   : > { %v2607_v8 = vpop.eup %2606  ;;  %v1863_v10 = vsel %vm1837_vm2, %v1830_v5, 0.0 }
 0x3aa   : > { %1895 = vst [vmem:[%s3159_s9 + $0xc8] sm:$0xff] %v1863_v10  ;;  %v1835_v49 = vsel %vm258_vm0, %v2607_v8, %v1770_v9 }
 0x3ab   : > { %v2609_v11 = vpop.eup %2608  ;;  %v1868_v13 = vsel %vm1837_vm2, %v1835_v49, 0.0 }
 0x3ac   : > { %1900 = vst [vmem:[%s3159_s9 + $0xf0] sm:$0xff] %v1868_v13  ;;  %v1833_v25 = vsel %vm258_vm0, %v2609_v11, %v1766_v54 }
 0x3ad   : > { %v2611_v30 = vpop.eup %2610  ;;  %v1866_v15 = vsel %vm1837_vm2, %v1833_v25, 0.0 }
 0x3ae   : > { %1898 = vst [vmem:[%s3159_s9 + $0xe0] sm:$0xff] %v1866_v15  ;;  %v1836_v16 = vsel %vm258_vm0, %v2611_v30, %v1772_v14 }
 0x3af   : > { %v2613_v12 = vpop.eup %2612  ;;  %v1869_v18 = vsel %vm1837_vm2, %v1836_v16, 0.0 }
 0x3b0   : > { %1901 = vst [vmem:[%s3159_s9 + $0xf8] sm:$0xff] %v1869_v18  ;;  %v1834_v57 = vsel %vm258_vm0, %v2613_v12, %v1768_v48 }
 0x3b1   : > { %v1867_v19 = vsel %vm1837_vm2, %v1834_v57, 0.0 }
 0x3b2   : > { %1899 = vst [vmem:[%s3159_s9 + $0xe8] sm:$0xff] %v1867_v19 }
 0x3b3   : > { %2627 = shalt.err (!%p2624_p3)
}
 0x3b4   : > { %s2628_s28 = scalar_lea.hbm %s3303_s20, 4096  ;;  %s2632_s4 = scalar_lea.hbm %s3356_s3, 8192 }
 0x3b5   : > { %p2629_p4 = scmp.ne.s32.totalorder %s3303_s20, %s2628_s28  ;;  %p2633_p9 = scmp.lt.s32.totalorder %s3303_s20, %s3356_s3 }
 0x3b6   : > { %p2634_p10 = scmp.lt.s32.totalorder %s2632_s4, %s2628_s28 }
 0x3b7   : > { %p2630_p7 = pnand %p2629_p4, %p2738_p5 }
 0x3b8   : > { %p2635_p11 = por %p2634_p10, %p2633_p9 }
 0x3b9   : > { %p2631_p8 = pneg %p2630_p7 }
 0x3bb   : > { %p2636_p12 = pnand %p2635_p11, %p2631_p8 }
 0x3bd   : > { %2639 = shalt.err (!%p2636_p12)
}
 0x3be   : > { %s2678_s7 = smov 128   ;;  %s2679_s8 = smov 8  }
 0x3bf   : > { %2420 = dma.vmem_to_hbm [thread:$0]  (%p2738_p5), %s3305_s11, 4096, %s3303_s20, %s3313_s16, %s2678_s7, %s2678_s7, %s2679_s8  }
 0x3c0 PF: > { %p2426_p13 = scmp.ge.s32.totalorder %s2674_s15, 2  ;;  %s1931_s9 = sand.u32 1, %s2662_s12  }
 0x3c1   : > { %s1932_s10 = scalar_lea.sflag [#allocation3], %s1931_s9 }
 0x3c2   : > { %p2423_p0 = pnand %p2426_p13, %p2742_p6 }
 0x3c4   : > { %p2424_p1 = pneg %p2423_p0 }
 0x3c6   : > { %2657 = dma.done.wait (%p2424_p1), %s1932_s10, 4096  }
 0x3c7   : > { %2659 = vsyncadd (%p2424_p1), %s1932_s10, 4294963200  ;;  %p13_p2 = scmp.ge.s32.totalorder %s2725_s18, 4   ;;  %s3359_s12 = smov %s2666_s13 }
 0x3c8   : > { %s3360_s13 = smov %s2670_s14  ;;  %s3361_s14 = smov %s2736_s21 }
 0x3c9   : > { %s3362_s15 = smov %s2725_s18  ;;  %15 = sbr.rel (!%p13_p2) target bundleno = 3 (0x3), region = 67 }
 0x3ce   :  { %1937 = vsyncpa [#allocation3], 1 }
 0x3cf   :  { %1939 = vsyncpa [#allocation3 + $0x1], 1 }

</bundles_post_ra>
